<compile_context>
chip_gen: v7x
topology: tpu7x:2x2x1
jax: 0.10.0
libtpu: 0.0.40
codegen_flags: <defaults>
</compile_context>

<pallas_src>
import functools
import math

import jax
import jax.numpy as jnp
import numpy as np
from jax.experimental import pallas as pl
from jax.experimental.pallas import tpu as pltpu

NUM_FREQ = 10                 # 2.0 ** linspace(0, 9, 10)
TWO_F = 2 * NUM_FREQ


def _cdiv(a, b):
    return -(-a // b)


def _round_up(a, b):
    return _cdiv(a, b) * b


def _posembed_kernel(x_ref, fmat_ref, sel_ref, o_ref, *, magnitude):
    """x_ref: (rt, k*C) packed rows -> o_ref: (rt, k*C*2F) lane-dense output."""
    x = x_ref[...].astype(jnp.float32)

    # Exact 3-way bf16 split: hi + mid + lo == x bit-exactly, so three bf16 MXU
    # passes against the (power-of-two) frequency matrix reproduce x * 2**p
    # exactly while the frequency expansion runs on the otherwise-idle MXU
    # instead of the VALU.
    x_hi = x.astype(jnp.bfloat16)
    r1 = x - x_hi.astype(jnp.float32)
    x_mid = r1.astype(jnp.bfloat16)
    x_lo = (r1 - x_mid.astype(jnp.float32)).astype(jnp.bfloat16)

    m = fmat_ref[...]                              # bf16, powers of two (exact)
    xf = (jnp.dot(x_hi, m, preferred_element_type=jnp.float32)
          + jnp.dot(x_mid, m, preferred_element_type=jnp.float32)
          + jnp.dot(x_lo, m, preferred_element_type=jnp.float32))

    # One dense sin pass + one dense cos pass (EUP), single lane select (VPU).
    emb = jnp.where(sel_ref[...] != 0, jnp.sin(xf), jnp.cos(xf))
    if magnitude != 1.0:                           # trace-time check
        emb = emb * jnp.float32(magnitude)
    o_ref[...] = emb.astype(o_ref.dtype)
    # TODO(synk): optional single-EUP-pass variant sin(xf + phase) (phase folded
    # into the matmul) if a bundle dump shows EUP-bound with bf16 output.


def pos_embed(x, magnitude=1.0, row_tile=4096, out_dtype=None):
    """x: [B, N, C] -> [B, N, C * 2 * NUM_FREQ] (matches PosEmbed.forward).

    out_dtype=jnp.bfloat16 halves the 20x-expanded HBM write stream when the
    consumer tolerates it; compute stays f32.
    """
    B, N, C = x.shape
    rows = B * N
    out_dim = C * TWO_F
    out_dtype = jnp.dtype(x.dtype if out_dtype is None else out_dtype)

    # ---- row-packing factor k: k*out_dim is a multiple of 128 (lane-dense
    # stores), scaled so the MXU contraction K = k*C approaches 128 when the
    # input is big enough to afford it.
    k0 = 128 // math.gcd(out_dim, 128)
    mxu_mult = max(1, 128 // (k0 * C))
    data_mult = max(1, rows // k0)
    k = k0 * max(1, min(mxu_mult, data_mult))
    lanes = k * out_dim
    kc = k * C

    # ---- trace-time constants, passed as kernel INPUTS (not closures) ----
    freq = (2.0 ** np.linspace(0.0, 9.0, NUM_FREQ)).astype(np.float32)
    pair = np.concatenate([freq, freq])            # per-channel [f0..f9, f0..f9]
    fmat_np = np.zeros((kc, lanes), dtype=np.float32)
    for j in range(k):
        for c in range(C):
            base = j * out_dim + c * TWO_F
            fmat_np[j * C + c, base:base + TWO_F] = pair
    fmat = jnp.asarray(fmat_np, dtype=jnp.bfloat16)   # powers of two: exact
    sel = jnp.asarray(
        ((np.arange(lanes) % TWO_F) < NUM_FREQ).astype(np.int32)[None, :])

    # ---- tiling over packed rows ----
    sub = max(8, 32 // min(np.dtype(x.dtype).itemsize, out_dtype.itemsize))
    rp = _round_up(max(_cdiv(rows, k), 1), sub)       # packed rows (padded)
    rt_target = max(sub, _round_up(max(1, row_tile // k), sub))
    min_tiles = 2 if rp >= 2 * sub else 1             # keep both v7x TCs busy
    num_tiles = max(min_tiles, _cdiv(rp, rt_target))
    rt = _round_up(_cdiv(rp, num_tiles), sub)
    num_tiles = _cdiv(rp, rt)
    rp_pad = rt * num_tiles
    rows_pad = rp_pad * k
    # VMEM: out tile rt*lanes*4 (<= ~1.3 MB at defaults) + bf16 fmat + input,
    # double-buffered -> a few MB, far under the scoped limit on all gens.

    x2 = x.reshape(rows, C)
    if rows_pad != rows:
        x2 = jnp.pad(x2, ((0, rows_pad - rows), (0, 0)))
    x_packed = x2.reshape(rp_pad, kc)                 # free contiguous view

    kernel = functools.partial(_posembed_kernel, magnitude=float(magnitude))

    out_packed = pl.pallas_call(
        kernel,
        out_shape=jax.ShapeDtypeStruct((rp_pad, lanes), out_dtype),
        grid=(num_tiles,),
        in_specs=[
            pl.BlockSpec((rt, kc), lambda i: (i, 0)),
            pl.BlockSpec((kc, lanes), lambda i: (0, 0)),   # revisited: DMA'd once
            pl.BlockSpec((1, lanes), lambda i: (0, 0)),    # revisited: DMA'd once
        ],
        out_specs=pl.BlockSpec((rt, lanes), lambda i: (i, 0)),
        compiler_params=pltpu.CompilerParams(
            dimension_semantics=("parallel",)),
    )(x_packed, fmat, sel)

    out = out_packed.reshape(rows_pad, out_dim)       # free contiguous view
    if rows_pad != rows:
        # TODO(synk): this tail slice copies the expanded output once; pick
        # shapes with rows % (sub*k) == 0 (or consume the padded view) to avoid it.
        out = out[:rows]
    return out.reshape(B, N, out_dim)


def _pos_embed_ref(x, magnitude=1.0):
    # Pure-JAX reference mirroring the torch forward exactly.
    freq = (2.0 ** jnp.linspace(0.0, 9.0, NUM_FREQ)).astype(jnp.float32)
    xf = x[..., None].astype(jnp.float32) * freq                   # (B, N, C, F)
    emb = jnp.concatenate([jnp.sin(xf), jnp.cos(xf)], axis=-1)     # (B, N, C, 2F)
    B, N = x.shape[0], x.shape[1]
    return (magnitude * emb).reshape(B, N, -1).astype(x.dtype)


if __name__ == "__main__":
    key = jax.random.PRNGKey(0)
    cases = [
        ((2, 8, 4), 1.0),       # tiny shape consistent with the module
        ((2, 64, 4), 1.0),      # k=32 packing, K=128 MXU contraction
        ((1, 3000, 3), 0.5),    # C=3, multi-tile grid, padded tail, magnitude != 1
    ]
    for shape, magnitude in cases:
        key, subkey = jax.random.split(key)
        # Normalized-coordinate style inputs (|x| <= 1), the intended regime.
        x = jax.random.uniform(subkey, shape, dtype=jnp.float32,
                               minval=-1.0, maxval=1.0)

        out = jax.block_until_ready(pos_embed(x, magnitude=magnitude))
        ref = _pos_embed_ref(x, magnitude=magnitude)

        B, N, C = shape
        assert out.shape == (B, N, C * TWO_F), out.shape
        err = float(jnp.max(jnp.abs(out.astype(jnp.float32)
                                    - ref.astype(jnp.float32))))
        # Arguments are bit-identical to the reference; slack only covers
        # sin/cos implementation differences (Mosaic EUP vs XLA).
        assert jnp.allclose(out, ref, atol=1e-4, rtol=1e-5), (
            f"mismatch vs reference, max abs err = {err}")

    print("KERNEL_OK")
</pallas_src>

<mosaic_0001>
module attributes {stable_mosaic.version = 11 : i64} {
  func.func @_posembed_kernel(%arg0: i32, %arg1: memref<8x64xf32, #tpu.memory_space<vmem>>, %arg2: memref<64x1280xbf16, #tpu.memory_space<vmem>>, %arg3: memref<1x1280xi32, #tpu.memory_space<vmem>>, %arg4: memref<8x1280xf32, #tpu.memory_space<vmem>>) attributes {dimension_semantics = [#tpu.dimension_semantics<parallel>], iteration_bounds = array<i64: 1>, scalar_prefetch = 0 : i64, scratch_operands = 0 : i64, tpu.core_type = #tpu.core_type<tc>, window_params = [{transform_indices = @transform_0, window_bounds = array<i64: 8, 64>}, {pipeline_mode = #tpu.pipeline_mode<synchronous>, transform_indices = @transform_1, window_bounds = array<i64: 64, 1280>}, {pipeline_mode = #tpu.pipeline_mode<synchronous>, transform_indices = @transform_2, window_bounds = array<i64: 1, 1280>}, {transform_indices = @transform_3, window_bounds = array<i64: 8, 1280>}]} {
    %c0 = arith.constant 0 : index
    %c0_0 = arith.constant 0 : index
    %0 = vector.load %arg1[%c0, %c0_0] : memref<8x64xf32, #tpu.memory_space<vmem>>, vector<8x64xf32>
    %1 = arith.truncf %0 : vector<8x64xf32> to vector<8x64xbf16>
    %2 = arith.extf %1 : vector<8x64xbf16> to vector<8x64xf32>
    %3 = arith.subf %0, %2 : vector<8x64xf32>
    %4 = arith.truncf %3 : vector<8x64xf32> to vector<8x64xbf16>
    %5 = arith.extf %4 : vector<8x64xbf16> to vector<8x64xf32>
    %6 = arith.subf %3, %5 : vector<8x64xf32>
    %7 = arith.truncf %6 : vector<8x64xf32> to vector<8x64xbf16>
    %c0_1 = arith.constant 0 : index
    %c0_2 = arith.constant 0 : index
    %8 = vector.load %arg2[%c0_1, %c0_2] : memref<64x1280xbf16, #tpu.memory_space<vmem>>, vector<64x1280xbf16>
    %cst = arith.constant dense<0.000000e+00> : vector<8x1280xf32>
    %9 = tpu.matmul %1, %8, %cst {dimension_numbers = #tpu.dot_dimension_numbers<[1], [0], [0], [1], [0, 0, 1, 1], [], []>} : vector<8x64xbf16>, vector<64x1280xbf16>, vector<8x1280xf32> -> vector<8x1280xf32>
    %cst_3 = arith.constant dense<0.000000e+00> : vector<8x1280xf32>
    %10 = tpu.matmul %4, %8, %cst_3 {dimension_numbers = #tpu.dot_dimension_numbers<[1], [0], [0], [1], [0, 0, 1, 1], [], []>} : vector<8x64xbf16>, vector<64x1280xbf16>, vector<8x1280xf32> -> vector<8x1280xf32>
    %11 = arith.addf %9, %10 : vector<8x1280xf32>
    %cst_4 = arith.constant dense<0.000000e+00> : vector<8x1280xf32>
    %12 = tpu.matmul %7, %8, %cst_4 {dimension_numbers = #tpu.dot_dimension_numbers<[1], [0], [0], [1], [0, 0, 1, 1], [], []>} : vector<8x64xbf16>, vector<64x1280xbf16>, vector<8x1280xf32> -> vector<8x1280xf32>
    %13 = arith.addf %11, %12 : vector<8x1280xf32>
    %c0_5 = arith.constant 0 : index
    %c0_6 = arith.constant 0 : index
    %14 = vector.load %arg3[%c0_5, %c0_6] : memref<1x1280xi32, #tpu.memory_space<vmem>>, vector<1x1280xi32>
    %c0_i32 = arith.constant 0 : i32
    %15 = vector.broadcast %c0_i32 : i32 to vector<1x1280xi32>
    %16 = arith.cmpi ne, %14, %15 : vector<1x1280xi32>
    %17 = math.sin %13 : vector<8x1280xf32>
    %18 = math.cos %13 : vector<8x1280xf32>
    %19 = vector.shape_cast %16 : vector<1x1280xi1> to vector<1x1280xi1>
    %20 = vector.broadcast %19 : vector<1x1280xi1> to vector<8x1280xi1>
    %21 = arith.select %20, %17, %18 : vector<8x1280xi1>, vector<8x1280xf32>
    %c0_7 = arith.constant 0 : index
    %c0_8 = arith.constant 0 : index
    %22 = vector.load %arg4[%c0_7, %c0_8] : memref<8x1280xf32, #tpu.memory_space<vmem>>, vector<8x1280xf32>
    tpu.vector_store %arg4[%c0_7, %c0_8], %21 {strides = array<i32>} : memref<8x1280xf32, #tpu.memory_space<vmem>>, vector<8x1280xf32>,
    return
  }
  func.func @transform_0(%arg0: i32) -> (i32, i32) {
    %c0_i32 = arith.constant 0 : i32
    %c0_i32_0 = arith.constant 0 : i32
    return %arg0, %c0_i32 : i32, i32
  }
  func.func @transform_1(%arg0: i32) -> (i32, i32) {
    %c0_i32 = arith.constant 0 : i32
    %c0_i32_0 = arith.constant 0 : i32
    %c0_i32_1 = arith.constant 0 : i32
    return %c0_i32, %c0_i32_0 : i32, i32
  }
  func.func @transform_2(%arg0: i32) -> (i32, i32) {
    %c0_i32 = arith.constant 0 : i32
    %c0_i32_0 = arith.constant 0 : i32
    %c0_i32_1 = arith.constant 0 : i32
    return %c0_i32, %c0_i32_0 : i32, i32
  }
  func.func @transform_3(%arg0: i32) -> (i32, i32) {
    %c0_i32 = arith.constant 0 : i32
    %c0_i32_0 = arith.constant 0 : i32
    return %arg0, %c0_i32 : i32, i32
  }
}

</mosaic_0001>

<bundles_post_ra>
// kernel: tpu_custom_call.1
= control target key start
LH: loop header
LB: loop body
LE: loop exit
PB: predicated region body
PF: predicated region fallthrough
CT: control target
= control target key end

     0   :  { %8 = vsyncpa [#allocation3], 0  ;;  %s4867_s0 = inlined_call_operand.hbm [shape: f32[8,64], index: 0, kind: input, shape index: {}]   ;;  %s4868_s1 = inlined_call_operand.hbm [shape: bf16[64,1280], index: 1, kind: input, shape index: {}]   ;;  %s4869_s2 = inlined_call_operand.hbm [shape: s32[1,1280], index: 2, kind: input, shape index: {}]   ;;  %s4870_s3 = inlined_call_operand.hbm [shape: f32[8,1280], index: 3, kind: output, shape index: {}]  }
   0x1   :  { %9 = vsyncpa [#allocation6], 0 }
   0x2   :  { %10 = vsyncpa [#allocation4], 0  ;;  %s3518_s12 = smov [#allocation5]   ;;  %s3424_s16 = scalar_lea.hbm %s4868_s1, 5120 }
   0x3   :  { %s26_s13 = sshll.u32 %s3518_s12, 4  ;;  %p3425_p0 = scmp.ne.s32.totalorder %s4868_s1, %s3424_s16  ;;  %s27_s13 = int_to_ptr.vmem [resolvable:$true] %s26_s13 }
   0x4   :  { %p3428_p1 = scmp.lt.u32.totalorder %s3424_s16, %s4868_s1 }
   0x6   :  { %p3430_p2 = pnand %p3428_p1, %p3425_p0 }
   0x8   :  { %3433 = shalt.err (!%p3430_p2)
}
   0x9   :  { %s3434_s21 = scalar_lea.vmem %s27_s13, 5120  ;;  %p3439_p4 = scmp.lt.s32.totalorder %s27_s13, %s27_s13 }
   0xa   :  { %p3435_p3 = scmp.ne.s32.totalorder %s27_s13, %s3434_s21  ;;  %p3440_p5 = scmp.lt.s32.totalorder %s3434_s21, %s3434_s21 }
   0xc   :  { %p3441_p6 = por %p3440_p5, %p3439_p4 }
   0xe   :  { %p3442_p7 = pnand %p3441_p6, %p3435_p3 }
  0x10   :  { %3445 = shalt.err (!%p3442_p7)
}
  0x11   :  { %s3519_s22 = smov 640   ;;  %s3520_s23 = smov 40  }
  0x12   :  { %32 = dma.hbm_to_vmem [thread:$0]  %s4868_s1, 5120, %s27_s13, [#allocation6], %s3519_s22, %s3519_s22, %s3520_s23  }
  0x13   :  { %s3521_s26 = smov [#allocation2]   ;;  %s3522_s28 = smov [#allocation7]  }
  0x14   :  { %s17_s27 = sshll.u32 %s3521_s26, 4  ;;  %s39_s29 = sshll.u32 %s3522_s28, 4  ;;  %s18_s27 = int_to_ptr.vmem [resolvable:$true] %s17_s27  ;;  %s40_s29 = int_to_ptr.vmem [resolvable:$true] %s39_s29 }
  0x15   :  { %s3446_s5 = scalar_lea.hbm %s4867_s0, 128 }
  0x16   :  { %p3447_p8 = scmp.ne.s32.totalorder %s4867_s0, %s3446_s5  ;;  %p3450_p9 = scmp.lt.u32.totalorder %s3446_s5, %s4867_s0 }
  0x18   :  { %p3452_p10 = pnand %p3450_p9, %p3447_p8 }
  0x1a   :  { %3455 = shalt.err (!%p3452_p10)
}
  0x1b   :  { %s3456_s1 = scalar_lea.vmem %s18_s27, 128  ;;  %p3461_p12 = scmp.lt.s32.totalorder %s18_s27, %s18_s27 }
  0x1c   :  { %p3457_p11 = scmp.ne.s32.totalorder %s18_s27, %s3456_s1  ;;  %p3462_p13 = scmp.lt.s32.totalorder %s3456_s1, %s3456_s1 }
  0x1e   :  { %p3463_p0 = por %p3462_p13, %p3461_p12 }
  0x20   :  { %p3464_p1 = pnand %p3463_p0, %p3457_p11 }
  0x22   :  { %3467 = shalt.err (!%p3464_p1)
}
  0x23   :  { %20 = dma.hbm_to_vmem [thread:$0]  %s4867_s0, 128, %s18_s27, [#allocation3]  }
  0x24   :  { %s3468_s14 = scalar_lea.hbm %s4869_s2, 160 }
  0x25   :  { %p3469_p2 = scmp.ne.s32.totalorder %s4869_s2, %s3468_s14  ;;  %p3472_p3 = scmp.lt.u32.totalorder %s3468_s14, %s4869_s2 }
  0x27   :  { %p3474_p4 = pnand %p3472_p3, %p3469_p2 }
  0x29   :  { %3477 = shalt.err (!%p3474_p4)
}
  0x2a   :  { %s3478_s19 = scalar_lea.vmem %s40_s29, 160  ;;  %p3483_p6 = scmp.lt.s32.totalorder %s40_s29, %s40_s29 }
  0x2b   :  { %p3479_p5 = scmp.ne.s32.totalorder %s40_s29, %s3478_s19  ;;  %p3484_p7 = scmp.lt.s32.totalorder %s3478_s19, %s3478_s19 }
  0x2d   :  { %p3485_p8 = por %p3484_p7, %p3483_p6 }
  0x2f   :  { %p3486_p9 = pnand %p3485_p8, %p3479_p5 }
  0x31   :  { %3489 = shalt.err (!%p3486_p9)
}
  0x32   :  { %42 = dma.hbm_to_vmem [thread:$0]  %s4869_s2, 160, %s40_s29, [#allocation6]  }
  0x33   :  { %3512 = dma.done.wait [#allocation3], 128  }
  0x34   :  { %3513 = vsyncadd [#allocation3], 4294967168 }
  0x35   :  { %3514 = dma.done.wait [#allocation6], 5280  }
  0x36   :  { %3515 = vsyncadd [#allocation6], 4294962016  ;;  %v3523_v0 = vmov 0   ;;  %v3589_v1 = vld [vmem:[#allocation5 + $0x4] ss:$40 sps:$4 sm:$0xff]   ;;  %v53_v19 = vld [vmem:[#allocation2] sm:$0xff] }
  0x37   :  { %337 = vmatprep.mubr.bf16.mxu1 %v3523_v0  ;;  %419 = vmatprep.mubr.bf16.mxu0 %v3523_v0  ;;  %v3591_v2 = vld [vmem:[#allocation5 + $0x14] ss:$40 sps:$4 sm:$0xff]   ;;  %v3594_v3 = vld [vmem:[#allocation5] ss:$40 sps:$4 sm:$0xff]   ;;  %v3596_v4 = vld [vmem:[#allocation5 + $0x10] ss:$40 sps:$4 sm:$0xff]   ;;  %v3639_v20 = vpack.c.bf16 %v53_v19, %v53_v19 }
  0x38   :  { %305 = vmatprep.subr.bf16.mxu1 %v3589_v1  ;;  %387 = vmatprep.subr.bf16.mxu0 %v3591_v2  ;;  %v3599_v5 = vld [vmem:[#allocation5 + $0x54] ss:$40 sps:$4 sm:$0xff]   ;;  %v3603_v6 = vld [vmem:[#allocation5 + $0x64] ss:$40 sps:$4 sm:$0xff]   ;;  %v3605_v7 = vld [vmem:[#allocation5 + $0x50] ss:$40 sps:$4 sm:$0xff]  }
  0x39   :  { %306 = vmatpush1.bf16.msra.mxu1 %v3594_v3  ;;  %388 = vmatpush1.bf16.msra.mxu0 %v3596_v4  ;;  %v3608_v8 = vld [vmem:[#allocation5 + $0x60] ss:$40 sps:$4 sm:$0xff]   ;;  %v3611_v9 = vld [vmem:[#allocation5 + $0xa4] ss:$40 sps:$4 sm:$0xff]   ;;  %v3613_v10 = vld [vmem:[#allocation5 + $0xb4] ss:$40 sps:$4 sm:$0xff]   ;;  %v55_v21 = vunpack.c.l.bf16 %v3639_v20 }
  0x3a   :  { %307 = vmatprep.subr.bf16.mxu1 %v3599_v5  ;;  %389 = vmatprep.subr.bf16.mxu0 %v3603_v6  ;;  %v3615_v11 = vld [vmem:[#allocation5 + $0xa0] ss:$40 sps:$4 sm:$0xff]   ;;  %v3617_v12 = vld [vmem:[#allocation5 + $0xb0] ss:$40 sps:$4 sm:$0xff]   ;;  %v3621_v13 = vld [vmem:[#allocation5 + $0xf4] ss:$40 sps:$4 sm:$0xff]  }
  0x3b   :  { %v3625_v14 = vld [vmem:[#allocation5 + $0x104] ss:$40 sps:$4 sm:$0xff]   ;;  %v3627_v15 = vld [vmem:[#allocation5 + $0xf0] ss:$40 sps:$4 sm:$0xff]   ;;  %v3629_v16 = vld [vmem:[#allocation5 + $0x100] ss:$40 sps:$4 sm:$0xff]   ;;  %v56_v24 = vsub.f32 %v53_v19, %v55_v21  ;;  %v3012_v19 = vlaneseq }
  0x3c   :  { %v3633_v17 = vld [vmem:[#allocation5 + $0xc] ss:$40 sps:$4 sm:$0xff]   ;;  %v3646_v22 = vld [vmem:[#allocation5 + $0x8] ss:$40 sps:$4 sm:$0xff]   ;;  %vm301_vm0 = vcmask 523264   ;;  %s3530_s2 = smov [#allocation8]  }
  0x3d   :  { %308 = vmatpush1.bf16.msra.mxu1 %v3605_v7  ;;  %390 = vmatpush1.bf16.msra.mxu0 %v3608_v8  ;;  %v3637_v18 = vld [vmem:[#allocation5 + $0x24] ss:$40 sps:$4 sm:$0xff]   ;;  %v3648_v23 = vld [vmem:[#allocation5 + $0x20] ss:$40 sps:$4 sm:$0xff]   ;;  %v57_v26 = vpack.c.bf16 %v56_v24, %v56_v24  ;;  %v3652_v27 = vld [vmem:[#allocation5 + $0x74] ss:$40 sps:$4 sm:$0xff]  }
  0x3e   :  { %309 = vmatprep.subr.bf16.mxu1 %v3611_v9  ;;  %391 = vmatprep.subr.bf16.mxu0 %v3613_v10  ;;  %v3650_v25 = vld [vmem:[#allocation5 + $0x5c] ss:$40 sps:$4 sm:$0xff]   ;;  %v3656_v28 = vld [vmem:[#allocation5 + $0x58] ss:$40 sps:$4 sm:$0xff]   ;;  %v3662_v31 = vld [vmem:[#allocation5 + $0xac] ss:$40 sps:$4 sm:$0xff]  }
  0x3f   :  { %v3658_v29 = vld [vmem:[#allocation5 + $0x70] ss:$40 sps:$4 sm:$0xff]   ;;  %v58_v30 = vunpack.c.l.bf16 %v57_v26  ;;  %v3666_v32 = vld [vmem:[#allocation5 + $0xc4] ss:$40 sps:$4 sm:$0xff]   ;;  %v3676_v35 = vld [vmem:[#allocation5 + $0xc0] ss:$40 sps:$4 sm:$0xff]  }
  0x40   :  { %v3674_v34 = vld [vmem:[#allocation5 + $0xa8] ss:$40 sps:$4 sm:$0xff]   ;;  %v3680_v36 = vld [vmem:[#allocation5 + $0xfc] ss:$40 sps:$4 sm:$0xff]   ;;  %v3686_v38 = vld [vmem:[#allocation5 + $0xf8] ss:$40 sps:$4 sm:$0xff]  }
  0x41   :  { %310 = vmatpush1.bf16.msra.mxu1 %v3615_v11  ;;  %392 = vmatpush1.bf16.msra.mxu0 %v3617_v12  ;;  %v3668_v33 = vsub.f32 %v56_v24, %v58_v30  ;;  %v3682_v37 = vld [vmem:[#allocation5 + $0x114] ss:$40 sps:$4 sm:$0xff]   ;;  %v3688_v39 = vld [vmem:[#allocation5 + $0x110] ss:$40 sps:$4 sm:$0xff]   ;;  %s3088_s21 = sshll.u32 %s3530_s2, 4  ;;  %s3089_s21 = int_to_ptr.vmem [resolvable:$true] %s3088_s21 }
  0x42   :  { %311 = vmatprep.subr.bf16.mxu1 %v3621_v13  ;;  %393 = vmatprep.subr.bf16.mxu0 %v3625_v14  ;;  %v3692_v40 = vld [vmem:[#allocation5 + $0x1c] ss:$40 sps:$4 sm:$0xff]   ;;  %v3696_v41 = vld [vmem:[#allocation5 + $0x18] ss:$40 sps:$4 sm:$0xff]   ;;  %v3700_v42 = vld [vmem:[#allocation5 + $0x6c] ss:$40 sps:$4 sm:$0xff]   ;;  %p3495_p11 = scmp.lt.s32.totalorder %s3089_s21, %s3089_s21 }
  0x43   :  { %v3706_v43 = vld [vmem:[#allocation5 + $0x68] ss:$40 sps:$4 sm:$0xff]   ;;  %v3710_v44 = vld [vmem:[#allocation5 + $0xbc] ss:$40 sps:$4 sm:$0xff]   ;;  %v3716_v45 = vld [vmem:[#allocation5 + $0xb8] ss:$40 sps:$4 sm:$0xff]   ;;  %v60_v48 = vpack.c.bf16 %v3668_v33, %v3668_v33 }
  0x44   :  { %v3720_v46 = vld [vmem:[#allocation5 + $0x10c] ss:$40 sps:$4 sm:$0xff]   ;;  %v3724_v47 = vld [vmem:[#allocation5 + $0x108] ss:$40 sps:$4 sm:$0xff]   ;;  %s3490_s22 = scalar_lea.vmem %s3089_s21, 1280 }
  0x45   :  { %312 = vmatpush1.bf16.msra.mxu1 %v3627_v15  ;;  %394 = vmatpush1.bf16.msra.mxu0 %v3629_v16  ;;  %p3491_p10 = scmp.ne.s32.totalorder %s3089_s21, %s3490_s22  ;;  %p3496_p12 = scmp.lt.s32.totalorder %s3490_s22, %s3490_s22 }
  0x46   :  { %346 = vmatprep.subr.bf16.mxu1 %v3633_v17  ;;  %469 = vmatprep.subr.bf16.mxu0 %v3637_v18 }
  0x47   :  { %p3497_p13 = por %p3496_p12, %p3495_p11 }
  0x48   :  { %3138 = vmatmul.mubr.msk.bf16.vlgmr.msra.gmra.mrb[0].mxu1 %vm301_vm0, %v57_v26  ;;  %3140 = vmatmul.mubr.msk.bf16.vlgmr.msra.gmra.mrb[0].mxu0 %vm301_vm0, %v57_v26 }
  0x49   :  { %347 = vmatpush1.bf16.msra.mxu1 %v3646_v22  ;;  %470 = vmatpush1.bf16.msra.mxu0 %v3648_v23  ;;  %p3498_p0 = pnand %p3497_p13, %p3491_p10 }
  0x4a   :  { %348 = vmatprep.subr.bf16.mxu1 %v3650_v25  ;;  %471 = vmatprep.subr.bf16.mxu0 %v3652_v27 }
  0x4b   :  { %378 = vmatprep.mubr.bf16.mxu1 %v3523_v0  ;;  %501 = vmatprep.mubr.bf16.mxu0 %v3523_v0 }
  0x4d   :  { %349 = vmatpush1.bf16.msra.mxu1 %v3656_v28  ;;  %472 = vmatpush1.bf16.msra.mxu0 %v3658_v29 }
  0x4e   :  { %350 = vmatprep.subr.bf16.mxu1 %v3662_v31  ;;  %473 = vmatprep.subr.bf16.mxu0 %v3666_v32 }
  0x51   :  { %351 = vmatpush1.bf16.msra.mxu1 %v3674_v34  ;;  %474 = vmatpush1.bf16.msra.mxu0 %v3676_v35 }
  0x52   :  { %352 = vmatprep.subr.bf16.mxu1 %v3680_v36  ;;  %475 = vmatprep.subr.bf16.mxu0 %v3682_v37 }
  0x55   :  { %353 = vmatpush1.bf16.msra.mxu1 %v3686_v38  ;;  %476 = vmatpush1.bf16.msra.mxu0 %v3688_v39 }
  0x56   :  { %428 = vmatprep.subr.bf16.mxu1 %v3692_v40  ;;  %513 = vmatprep.subr.bf16.mxu0 %v3589_v1 }
  0x58   :  { %3139 = vmatmul.mubr.msk.bf16.vlgmr.msra.gmra.mrb[4].mxu1 %vm301_vm0, %v57_v26  ;;  %3142 = vmatmul.mubr.msk.bf16.vlgmr.msra.gmra.mrb[4].mxu0 %vm301_vm0, %v57_v26 }
  0x59   :  { %429 = vmatpush1.bf16.msra.mxu1 %v3696_v41  ;;  %514 = vmatpush1.bf16.msra.mxu0 %v3594_v3 }
  0x5a   :  { %430 = vmatprep.subr.bf16.mxu1 %v3700_v42  ;;  %515 = vmatprep.subr.bf16.mxu0 %v3599_v5 }
  0x5b   :  { %460 = vmatprep.mubr.bf16.mxu1 %v3523_v0  ;;  %545 = vmatprep.mubr.bf16.mxu0 %v3523_v0 }
  0x5d   :  { %431 = vmatpush1.bf16.msra.mxu1 %v3706_v43  ;;  %516 = vmatpush1.bf16.msra.mxu0 %v3605_v7 }
  0x5e   :  { %432 = vmatprep.subr.bf16.mxu1 %v3710_v44  ;;  %517 = vmatprep.subr.bf16.mxu0 %v3611_v9 }
  0x61   :  { %433 = vmatpush1.bf16.msra.mxu1 %v3716_v45  ;;  %518 = vmatpush1.bf16.msra.mxu0 %v3615_v11 }
  0x62   :  { %434 = vmatprep.subr.bf16.mxu1 %v3720_v46  ;;  %519 = vmatprep.subr.bf16.mxu0 %v3621_v13 }
  0x65   :  { %435 = vmatpush1.bf16.msra.mxu1 %v3724_v47  ;;  %520 = vmatpush1.bf16.msra.mxu0 %v3627_v15 }
  0x66   :  { %554 = vmatprep.subr.bf16.mxu1 %v3633_v17  ;;  %595 = vmatprep.subr.bf16.mxu0 %v3591_v2 }
  0x68   :  { %3141 = vmatmul.mubr.msk.bf16.vlgmr.msra.gmra.mrb[8].mxu1 %vm301_vm0, %v57_v26  ;;  %3143 = vmatmul.mubr.msk.bf16.vlgmr.msra.gmra.mrb[8].mxu0 %vm301_vm0, %v3639_v20 }
  0x69   :  { %555 = vmatpush1.bf16.msra.mxu1 %v3646_v22  ;;  %596 = vmatpush1.bf16.msra.mxu0 %v3596_v4 }
  0x6a   :  { %556 = vmatprep.subr.bf16.mxu1 %v3650_v25  ;;  %597 = vmatprep.subr.bf16.mxu0 %v3603_v6 }
  0x6b   :  { %586 = vmatprep.mubr.bf16.mxu1 %v3523_v0  ;;  %627 = vmatprep.mubr.bf16.mxu0 %v3523_v0 }
  0x6d   :  { %557 = vmatpush1.bf16.msra.mxu1 %v3656_v28  ;;  %598 = vmatpush1.bf16.msra.mxu0 %v3608_v8 }
  0x6e   :  { %558 = vmatprep.subr.bf16.mxu1 %v3662_v31  ;;  %599 = vmatprep.subr.bf16.mxu0 %v3613_v10 }
  0x71   :  { %559 = vmatpush1.bf16.msra.mxu1 %v3674_v34  ;;  %600 = vmatpush1.bf16.msra.mxu0 %v3617_v12 }
  0x72   :  { %560 = vmatprep.subr.bf16.mxu1 %v3680_v36  ;;  %601 = vmatprep.subr.bf16.mxu0 %v3625_v14 }
  0x75   :  { %561 = vmatpush1.bf16.msra.mxu1 %v3686_v38  ;;  %602 = vmatpush1.bf16.msra.mxu0 %v3629_v16 }
  0x76   :  { %636 = vmatprep.subr.bf16.mxu1 %v3692_v40  ;;  %677 = vmatprep.subr.bf16.mxu0 %v3637_v18 }
  0x78   :  { %3144 = vmatmul.mubr.msk.bf16.vlgmr.msra.gmra.mrb[4].mxu1 %vm301_vm0, %v3639_v20  ;;  %3145 = vmatmul.mubr.msk.bf16.vlgmr.msra.gmra.mrb[0].mxu0 %vm301_vm0, %v3639_v20 }
  0x79   :  { %637 = vmatpush1.bf16.msra.mxu1 %v3696_v41  ;;  %678 = vmatpush1.bf16.msra.mxu0 %v3648_v23 }
  0x7a   :  { %638 = vmatprep.subr.bf16.mxu1 %v3700_v42  ;;  %679 = vmatprep.subr.bf16.mxu0 %v3652_v27 }
  0x7b   :  { %668 = vmatprep.mubr.bf16.mxu1 %v3523_v0  ;;  %709 = vmatprep.mubr.bf16.mxu0 %v3523_v0 }
  0x7d   :  { %639 = vmatpush1.bf16.msra.mxu1 %v3706_v43  ;;  %680 = vmatpush1.bf16.msra.mxu0 %v3658_v29 }
  0x7e   :  { %640 = vmatprep.subr.bf16.mxu1 %v3710_v44  ;;  %681 = vmatprep.subr.bf16.mxu0 %v3666_v32 }
  0x81   :  { %641 = vmatpush1.bf16.msra.mxu1 %v3716_v45  ;;  %682 = vmatpush1.bf16.msra.mxu0 %v3676_v35 }
  0x82   :  { %642 = vmatprep.subr.bf16.mxu1 %v3720_v46  ;;  %683 = vmatprep.subr.bf16.mxu0 %v3682_v37 }
  0x85   :  { %643 = vmatpush1.bf16.msra.mxu1 %v3724_v47  ;;  %684 = vmatpush1.bf16.msra.mxu0 %v3688_v39 }
  0x86   :  { %721 = vmatprep.subr.bf16.mxu0 %v3589_v1  ;;  %762 = vmatprep.subr.bf16.mxu1 %v3633_v17 }
  0x88   :  { %3146 = vmatmul.mubr.msk.bf16.vlgmr.msra.gmra.mrb[8].mxu1 %vm301_vm0, %v3639_v20  ;;  %3147 = vmatmul.mubr.msk.bf16.vlgmr.msra.gmra.mrb[4].mxu0 %vm301_vm0, %v3639_v20 }
  0x89   :  { %722 = vmatpush1.bf16.msra.mxu0 %v3594_v3  ;;  %763 = vmatpush1.bf16.msra.mxu1 %v3646_v22 }
  0x8a   :  { %723 = vmatprep.subr.bf16.mxu0 %v3599_v5  ;;  %764 = vmatprep.subr.bf16.mxu1 %v3650_v25 }
  0x8b   :  { %753 = vmatprep.mubr.bf16.mxu0 %v3523_v0  ;;  %794 = vmatprep.mubr.bf16.mxu1 %v3523_v0 }
  0x8d   :  { %724 = vmatpush1.bf16.msra.mxu0 %v3605_v7  ;;  %765 = vmatpush1.bf16.msra.mxu1 %v3656_v28 }
  0x8e   :  { %725 = vmatprep.subr.bf16.mxu0 %v3611_v9  ;;  %766 = vmatprep.subr.bf16.mxu1 %v3662_v31 }
  0x91   :  { %726 = vmatpush1.bf16.msra.mxu0 %v3615_v11  ;;  %767 = vmatpush1.bf16.msra.mxu1 %v3674_v34  ;;  %v3526_v34 = vmov 2131351028  }
  0x92   :  { %727 = vmatprep.subr.bf16.mxu0 %v3621_v13  ;;  %768 = vmatprep.subr.bf16.mxu1 %v3680_v36 }
  0x95   :  { %728 = vmatpush1.bf16.msra.mxu0 %v3627_v15  ;;  %769 = vmatpush1.bf16.msra.mxu1 %v3686_v38  ;;  %v3527_v38 = vmov 2102212464  }
  0x96   :  { %803 = vmatprep.subr.bf16.mxu0 %v3591_v2  ;;  %844 = vmatprep.subr.bf16.mxu1 %v3692_v40  ;;  %v3528_v40 = vmov 920167782  }
  0x98   :  { %3148 = vmatmul.mubr.msk.bf16.vlgmr.msra.gmra.mrb[8].mxu0 %vm301_vm0, %v60_v48  ;;  %3149 = vmatmul.mubr.msk.bf16.vlgmr.msra.gmra.mrb[4].mxu1 %vm301_vm0, %v60_v48 }
  0x99   :  { %804 = vmatpush1.bf16.msra.mxu0 %v3596_v4  ;;  %845 = vmatpush1.bf16.msra.mxu1 %v3696_v41 }
  0x9a   :  { %805 = vmatprep.subr.bf16.mxu0 %v3603_v6  ;;  %846 = vmatprep.subr.bf16.mxu1 %v3700_v42 }
  0x9b   :  { %835 = vmatprep.mubr.bf16.mxu0 %v3523_v0  ;;  %876 = vmatprep.mubr.bf16.mxu1 %v3523_v0 }
  0x9d   :  { %806 = vmatpush1.bf16.msra.mxu0 %v3608_v8  ;;  %847 = vmatpush1.bf16.msra.mxu1 %v3706_v43 }
  0x9e   :  { %807 = vmatprep.subr.bf16.mxu0 %v3613_v10  ;;  %848 = vmatprep.subr.bf16.mxu1 %v3710_v44 }
  0xa1   :  { %808 = vmatpush1.bf16.msra.mxu0 %v3617_v12  ;;  %849 = vmatpush1.bf16.msra.mxu1 %v3716_v45 }
  0xa2   :  { %809 = vmatprep.subr.bf16.mxu0 %v3625_v14  ;;  %850 = vmatprep.subr.bf16.mxu1 %v3720_v46 }
  0xa5   :  { %810 = vmatpush1.bf16.msra.mxu0 %v3629_v16  ;;  %851 = vmatpush1.bf16.msra.mxu1 %v3724_v47 }
  0xa6   :  { %885 = vmatprep.subr.bf16.mxu0 %v3637_v18 }
  0xa8   :  { %3150 = vmatmul.mubr.msk.bf16.vlgmr.msra.gmra.mrb[0].mxu0 %vm301_vm0, %v60_v48  ;;  %3151 = vmatmul.mubr.msk.bf16.vlgmr.msra.gmra.mrb[8].mxu1 %vm301_vm0, %v60_v48 }
  0xa9   :  { %886 = vmatpush1.bf16.msra.mxu0 %v3648_v23  ;;  %917 = vmatprep.mubr.bf16.mxu0 %v3523_v0 }
  0xaa   :  { %887 = vmatprep.subr.bf16.mxu0 %v3652_v27  ;;  %v3524_v27 = vmov 683565275  }
  0xad   :  { %888 = vmatpush1.bf16.msra.mxu0 %v3658_v29 }
  0xae   :  { %889 = vmatprep.subr.bf16.mxu0 %v3666_v32  ;;  %v3525_v32 = vmov 2475754826  }
  0xb1   :  { %890 = vmatpush1.bf16.msra.mxu0 %v3676_v35 }
  0xb2   :  { %891 = vmatprep.subr.bf16.mxu0 %v3682_v37 }
  0xb5   :  { %892 = vmatpush1.bf16.msra.mxu0 %v3688_v39 }
  0xb8   :  { %3152 = vmatmul.mubr.msk.bf16.vlgmr.msra.gmra.mrb[4].mxu0 %vm301_vm0, %v60_v48 }
 0x11b   :  { %v339_v49 = vpop.f32.mrb[0].mxu1 }
 0x11c   :  { %v341_v50 = vpop.f32.mrb[1].mxu1 }
 0x11d   :  { %v343_v51 = vpop.f32.mrb[2].mxu1 }
 0x11e   :  { %v344_v52 = vpop.f32.mrb[3].mxu1 }
 0x16b   :  { %v755_v53 = vpop.f32.mrb[8].mxu0  ;;  %v3829_v54 = vpop.f32.mrb[4].mxu1 }
 0x16c   :  { %v3831_v55 = vadd.f32 %v755_v53, %v339_v49  ;;  %v1148_v56 = vand.u32 2147483647, %v3829_v54  ;;  %v1151_v57 = vand.u32 2139095040, %v3829_v54  ;;  %v757_v58 = vpop.f32.mrb[9].mxu0  ;;  %v3835_v59 = vpop.f32.mrb[5].mxu1 }
 0x16d   :  { %v3837_v60 = vadd.f32 %v757_v58, %v341_v50  ;;  %v759_v61 = vpop.f32.mrb[10].mxu0  ;;  %v800_v62 = vpop.f32.mrb[6].mxu1  ;;  %v3529_v50 = vmov 1326507024  }
 0x16e   :  { %v940_v63 = vand.u32 2147483647, %v3831_v55  ;;  %v943_v1 = vand.u32 2139095040, %v3831_v55  ;;  %v760_v2 = vpop.f32.mrb[11].mxu0  ;;  %v801_v3 = vpop.f32.mrb[7].mxu1  ;;  %v1152_v4 = vshrl.u32 %v1151_v57, 23 }
 0x16f   :  { %v1155_v7 = vand.u32 8388607, %v1148_v56  ;;  %v1047_v8 = vand.u32 2139095040, %v3837_v60  ;;  %vm942_vm15 = vcmp.lt.s32.totalorder %v3831_v55, 0 }
 0x170   :  { %v944_v5 = vshrl.u32 %v943_v1, 23  ;;  %v947_v6 = vand.u32 8388607, %v940_v63  ;;  %v3161_v9 = vadd.s32 4294967169, %v1152_v4  ;;  %vm3999_vm0 = vcmp.le.f32.partialorder %v940_v63, 0.7853982 }
 0x171   :  { %v1048_v11 = vshrl.u32 %v1047_v8, 23  ;;  %v1156_v15 = vor.u32 8388608, %v1155_v7 }
 0x172   :  { %v3153_v10 = vadd.s32 4294967169, %v944_v5  ;;  %v1158_v12 = vadd.s32 1, %v3161_v9  ;;  %v948_v13 = vor.u32 8388608, %v947_v6 }
 0x173   :  { %v3157_v16 = vadd.s32 4294967169, %v1048_v11  ;;  %v3850_v24 = vshll.u32 %v1156_v15, 8 }
 0x174   :  { %v950_v14 = vadd.s32 1, %v3153_v10  ;;  %vm1159_vm1 = vcmp.gt.s32.totalorder %v1158_v12, 0  ;;  %v3848_v23 = vshll.u32 %v948_v13, 8 }
 0x175   :  { %v1160_v17 = vsel %vm1159_vm1, %v1158_v12, 0  ;;  %v3859_v29 = vadd.s32 1, %v3157_v16 }
 0x176   :  { %vm951_vm2 = vcmp.gt.s32.totalorder %v950_v14, 0  ;;  %v3846_v20 = vand.u32 31, %v1160_v17  ;;  %v3852_v25 = vshrl.u32 %v1160_v17, 5 }
 0x177   :  { %v952_v18 = vsel %vm951_vm2, %v950_v14, 0  ;;  %vm1055_vm6 = vcmp.gt.s32.totalorder %v3859_v29, 0 }
 0x178   :  { %v953_v21 = vshrl.u32 %v952_v18, 5  ;;  %v954_v22 = vand.u32 31, %v952_v18  ;;  %v3855_v26 = vsub.s32 32, %v3846_v20  ;;  %v1165_v28 = vshll.u32 %v3524_v27, %v3846_v20 }
 0x179   :  { %v1168_v33 = vshll.u32 %v3525_v32, %v3846_v20  ;;  %v1171_v35 = vshll.u32 %v3526_v34, %v3846_v20  ;;  %vm1180_vm8 = vcmp.lt.s32.totalorder %v3852_v25, 1  ;;  %vm1181_vm9 = vcmp.lt.s32.totalorder %v3852_v25, 2 }
 0x17a   :  { %v955_v30 = vsub.s32 32, %v954_v22  ;;  %v957_v31 = vshll.u32 %v3524_v27, %v954_v22  ;;  %v960_v36 = vshll.u32 %v3525_v32, %v954_v22  ;;  %v963_v37 = vshll.u32 %v3526_v34, %v954_v22 }
 0x17b   :  { %v966_v39 = vshll.u32 %v3527_v38, %v954_v22  ;;  %v969_v41 = vshll.u32 %v3528_v40, %v954_v22  ;;  %v3870_v42 = vpop.f32.mrb[0].mxu0  ;;  %v3872_v43 = vpop.f32.mrb[8].mxu1  ;;  %vm972_vm3 = vcmp.lt.s32.totalorder %v953_v21, 1  ;;  %vm974_vm4 = vcmp.lt.s32.totalorder %v953_v21, 3 }
 0x17c   :  { %v958_v44 = vshrl.u32 %v3525_v32, %v955_v30  ;;  %v961_v45 = vshrl.u32 %v3526_v34, %v955_v30  ;;  %v964_v46 = vshrl.u32 %v3527_v38, %v955_v30  ;;  %v3877_v47 = vpop.f32.mrb[1].mxu0  ;;  %v956_v48 = vshrl.u32 %v3524_v27, %v955_v30  ;;  %v3882_v61 = vpop.f32.mrb[9].mxu1 }
 0x17d   :  { %v967_v49 = vshrl.u32 %v3528_v40, %v955_v30  ;;  %v970_v51 = vshrl.u32 %v3529_v50, %v955_v30  ;;  %v841_v52 = vpop.f32.mrb[2].mxu0  ;;  %vm975_vm5 = vcmp.lt.s32.totalorder %v953_v21, 4  ;;  %v1166_v3 = vshrl.u32 %v3525_v32, %v3855_v26  ;;  %v882_v5 = vpop.f32.mrb[10].mxu1 }
 0x17e   :  { %v959_v53 = vor.u32 %v958_v44, %v957_v31  ;;  %v962_v57 = vor.u32 %v961_v45, %v960_v36  ;;  %v965_v58 = vor.u32 %v964_v46, %v963_v37  ;;  %v842_v62 = vpop.f32.mrb[3].mxu0  ;;  %v1169_v4 = vshrl.u32 %v3526_v34, %v3855_v26  ;;  %v883_v10 = vpop.f32.mrb[11].mxu1 }
 0x17f   :  { %v968_v1 = vor.u32 %v967_v49, %v966_v39  ;;  %v971_v2 = vor.u32 %v970_v51, %v969_v41  ;;  %vm973_vm7 = vcmp.lt.s32.totalorder %v953_v21, 2  ;;  %v1167_v17 = vor.u32 %v1166_v3, %v1165_v28 }
 0x180   :  { %v976_v6 = vsel %vm972_vm3, %v956_v48, %v959_v53  ;;  %v977_v7 = vsel %vm975_vm5, %v965_v58, 2102212464  ;;  %v980_v8 = vsel %vm972_vm3, %v959_v53, %v962_v57  ;;  %v984_v9 = vsel %vm972_vm3, %v962_v57, %v965_v58 }
 0x181   :  { %v978_v11 = vsel %vm974_vm4, %v962_v57, %v977_v7  ;;  %v981_v12 = vsel %vm975_vm5, %v968_v1, 920167782  ;;  %v985_v13 = vsel %vm975_vm5, %v971_v2, 1326507024  ;;  %v1170_v30 = vor.u32 %v1169_v4, %v1168_v33 }
 0x182   :  { %v979_v14 = vsel %vm973_vm7, %v976_v6, %v978_v11  ;;  %v982_v15 = vsel %vm974_vm4, %v965_v58, %v981_v12  ;;  %v986_v16 = vsel %vm974_vm4, %v968_v1, %v985_v13  ;;  %v1172_v31 = vshrl.u32 %v3527_v38, %v3855_v26 }
 0x183   :  { %v983_v18 = vsel %vm973_vm7, %v980_v8, %v982_v15  ;;  %v987_v22 = vsel %vm973_vm7, %v984_v9, %v986_v16  ;;  %v1164_v21 = vshrl.u32 %v3524_v27, %v3855_v26  ;;  %v1174_v28 = vshll.u32 %v3527_v38, %v3846_v20  ;;  %v936_v9 = vld [vmem:[#allocation7] sm:$0xff] }
 0x184   :  { %v3901_v36 = vmul.u32.u64.low %v3848_v23, %v987_v22  ;;  %v3902_v37 = vmul.u32.u64.high %v3848_v23, %v987_v22, %v3901_v36  ;;  %v3905_v39 = vmul.u32.u64.low %v3848_v23, %v983_v18  ;;  %v3906_v41 = vmul.u32.u64.high %v3848_v23, %v983_v18, %v3905_v39 }
 0x185   :  { %v1173_v44 = vor.u32 %v1172_v31, %v1171_v35  ;;  %v1175_v33 = vshrl.u32 %v3528_v40, %v3855_v26  ;;  %v995_v45 = vmul.u32 %v3848_v23, %v979_v14  ;;  %v1177_v46 = vshll.u32 %v3528_v40, %v3846_v20 }
 0x186   :  { %v1178_v48 = vshrl.u32 %v3529_v50, %v3855_v26  ;;  %vm1182_vm10 = vcmp.lt.s32.totalorder %v3852_v25, 3  ;;  %vm1183_vm11 = vcmp.lt.s32.totalorder %v3852_v25, 4  ;;  %vm997_vm12 = vc.u32 %v3902_v37, %v3905_v39 }
 0x187   :  { %v1176_v49 = vor.u32 %v1175_v33, %v1174_v28  ;;  %v998_v23 = vadd.s32 1, %v3906_v41  ;;  %v1188_v51 = vsel %vm1180_vm8, %v1167_v17, %v1170_v30  ;;  %v1184_v20 = vsel %vm1180_vm8, %v1164_v21, %v1167_v17 }
 0x188   :  { %v1179_v35 = vor.u32 %v1178_v48, %v1177_v46  ;;  %v1185_v52 = vsel %vm1183_vm11, %v1173_v44, 2102212464  ;;  %v1192_v26 = vsel %vm1180_vm8, %v1170_v30, %v1173_v44  ;;  %v1056_v1 = vsel %vm1055_vm6, %v3859_v29, 0 }
 0x189   :  { %v1189_v53 = vsel %vm1183_vm11, %v1176_v49, 920167782  ;;  %v999_v57 = vsel %vm997_vm12, %v998_v23, %v3906_v41  ;;  %v1186_v3 = vsel %vm1182_vm10, %v1170_v30, %v1185_v52  ;;  %v1044_v29 = vand.u32 2147483647, %v3837_v60 }
 0x18a   :  { %v1190_v58 = vsel %vm1182_vm10, %v1173_v44, %v1189_v53  ;;  %v1193_v62 = vsel %vm1183_vm11, %v1179_v35, 1326507024  ;;  %v1000_v2 = vadd.s32 %v999_v57, %v995_v45  ;;  %v3952_v13 = vshrl.u32 %v3012_v19, 7 }
 0x18b   :  { %v1191_v4 = vsel %vm1181_vm9, %v1188_v51, %v1190_v58  ;;  %v1194_v5 = vsel %vm1182_vm10, %v1176_v49, %v1193_v62  ;;  %v1187_v14 = vsel %vm1181_vm9, %v1184_v20, %v1186_v3  ;;  %v1058_v15 = vand.u32 31, %v1056_v1 }
 0x18c   :  { %v1195_v6 = vsel %vm1181_vm9, %v1192_v26, %v1194_v5  ;;  %v3942_v7 = vmul.u32.u64.low %v3850_v24, %v1191_v4  ;;  %v3943_v8 = vmul.u32.u64.high %v3850_v24, %v1191_v4, %v3942_v7  ;;  %v1001_v10 = vadd.s32 536870912, %v1000_v2 }
 0x18d   :  { %v3948_v11 = vmul.u32.u64.low %v3850_v24, %v1195_v6  ;;  %v3949_v12 = vmul.u32.u64.high %v3850_v24, %v1195_v6, %v3948_v11  ;;  %v1255_v17 = vand.u32 2139095040, %v3835_v59  ;;  %vm938_vm13 = vcmp.ne.s32.totalorder %v936_v9, 0 }
 0x18e   :  { %v3956_v16 = vshrl.u32 %v1001_v10, 30  ;;  %v3014_v18 = vsub.s32 0, %v3952_v13  ;;  %v1206_v22 = vadd.s32 1, %v3943_v8  ;;  %v1051_v30 = vand.u32 8388607, %v1044_v29 }
 0x18f   :  { %v1203_v19 = vmul.u32 %v3850_v24, %v1187_v14  ;;  %vm1205_vm14 = vc.u32 %v3949_v12, %v3942_v7  ;;  %v1059_v25 = vsub.s32 32, %v1058_v15  ;;  %v3971_v21 = vsel %vm938_vm13, 1, %v3523_v0 }
 0x190   :  { %v1003_v31 = vshll.u32 %v3956_v16, 30  ;;  %v1207_v36 = vsel %vm1205_vm14, %v1206_v22, %v3943_v8  ;;  %v1256_v28 = vshrl.u32 %v1255_v17, 23  ;;  %v3976_v33 = vrot.slane %v3971_v21, %v3014_v18 }
 0x191   :  { %v1208_v44 = vadd.s32 %v1207_v36, %v1203_v19  ;;  %v3022_v24 = vsub.s32 2, %v3952_v13  ;;  %v1252_v45 = vand.u32 2147483647, %v3835_v59  ;;  %v1052_v49 = vor.u32 8388608, %v1051_v30 }
 0x192   :  { %v3968_v41 = vsub.s32 %v1000_v2, %v1003_v31  ;;  %v1062_v23 = vshrl.u32 %v3525_v32, %v1059_v25  ;;  %v1065_v35 = vshrl.u32 %v3526_v34, %v1059_v25  ;;  %v1068_v51 = vshrl.u32 %v3527_v38, %v1059_v25 }
 0x193   :  { %v1209_v48 = vadd.s32 536870912, %v1208_v44  ;;  %v1070_v20 = vshll.u32 %v3527_v38, %v1058_v15  ;;  %v1071_v52 = vshrl.u32 %v3528_v40, %v1059_v25  ;;  %v1057_v26 = vshrl.u32 %v1056_v1, 5 }
 0x194   :  { %v1006_v46 = vsub.s32 0, %v3968_v41  ;;  %v1061_v57 = vshll.u32 %v3524_v27, %v1058_v15  ;;  %v3165_v58 = vadd.s32 4294967169, %v1256_v28  ;;  %v1064_v2 = vshll.u32 %v3525_v32, %v1058_v15 }
 0x195   :  { %v3988_v62 = vshrl.u32 %v1209_v48, 30  ;;  %v1067_v3 = vshll.u32 %v3526_v34, %v1058_v15  ;;  %v1072_v4 = vor.u32 %v1071_v52, %v1070_v20  ;;  %v996_v5 = vadd.s32 %v3905_v39, %v3902_v37 }
 0x196   :  { %v3154_v53 = vmin.u32 %v1006_v46, %v3968_v41  ;;  %v3995_v8 = vshll.u32 %v1052_v49, 8  ;;  %v1063_v10 = vor.u32 %v1062_v23, %v1061_v57  ;;  %v1066_v11 = vor.u32 %v1065_v35, %v1064_v2 }
 0x197   :  { %v1211_v9 = vshll.u32 %v3988_v62, 30  ;;  %v1069_v14 = vor.u32 %v1068_v51, %v1067_v3  ;;  %v1074_v22 = vshrl.u32 %v3529_v50, %v1059_v25  ;;  %vm1079_vm1 = vcmp.lt.s32.totalorder %v1057_v26, 4 }
 0x198   :  { %v1008_v6 = vclz %v3154_v53  ;;  %v1262_v30 = vadd.s32 1, %v3165_v58  ;;  %v1026_v37 = vsub.s32 4, %v3956_v16  ;;  %vm1076_vm2 = vcmp.lt.s32.totalorder %v1057_v26, 1 }
 0x199   :  { %v4006_v39 = vsub.s32 %v1208_v44, %v1211_v9  ;;  %v1085_v63 = vsel %vm1079_vm1, %v1072_v4, 920167782  ;;  %v1073_v31 = vshll.u32 %v3528_v40, %v1058_v15  ;;  %vm1077_vm4 = vcmp.lt.s32.totalorder %v1057_v26, 2 }
 0x19a   :  { %v3155_v17 = vadd.s32 4294967294, %v1008_v6  ;;  %vm1078_vm5 = vcmp.lt.s32.totalorder %v1057_v26, 3  ;;  %v1084_v28 = vsel %vm1076_vm2, %v1063_v10, %v1066_v11  ;;  %v1081_v44 = vsel %vm1079_vm1, %v1069_v14, 2102212464 }
 0x19b   :  { %v1214_v36 = vsub.s32 0, %v4006_v39  ;;  %v1086_v46 = vsel %vm1078_vm5, %v1069_v14, %v1085_v63  ;;  %v1075_v23 = vor.u32 %v1074_v22, %v1073_v31  ;;  %v1027_v35 = vsel %vm942_vm15, %v1026_v37, %v3956_v16 }
 0x19c   :  { %vm3156_vm3 = vcmp.lt.s32.totalorder %v3155_v17, 0  ;;  %v1204_v15 = vadd.s32 %v3942_v7, %v3949_v12  ;;  %v1060_v20 = vshrl.u32 %v3524_v27, %v1059_v25  ;;  %v1087_v58 = vsel %vm1077_vm4, %v1084_v28, %v1086_v46 }
 0x19d   :  { %v1011_v19 = vsel %vm3156_vm3, 0, %v3155_v17  ;;  %v3162_v51 = vmin.u32 %v1214_v36, %v4006_v39  ;;  %v1082_v6 = vsel %vm1078_vm5, %v1066_v11, %v1081_v44  ;;  %v1088_v16 = vsel %vm1076_vm2, %v1066_v11, %v1069_v14 }
 0x19e   :  { %v1012_v48 = vsub.s32 32, %v1011_v19  ;;  %v1016_v49 = vsub.s32 4294967266, %v1011_v19  ;;  %v1013_v52 = vshll.u32 %v3968_v41, %v1011_v19  ;;  %v1080_v3 = vsel %vm1076_vm2, %v1060_v20, %v1063_v10 }
 0x19f   :  { %v1216_v2 = vclz %v3162_v51  ;;  %v1029_v7 = vsel %vm3999_vm0, 0, %v1027_v35  ;;  %v1089_v12 = vsel %vm1079_vm1, %v1075_v23, 1326507024  ;;  %v1083_v37 = vsel %vm1077_vm4, %v1080_v3, %v1082_v6 }
 0x1a0   :  { %v1014_v53 = vshrl.u32 %v996_v5, %v1012_v48  ;;  %v1017_v57 = vadd.s32 127, %v1016_v49  ;;  %v1090_v41 = vsel %vm1078_vm5, %v1072_v4, %v1089_v12  ;;  %vm1263_vm6 = vcmp.gt.s32.totalorder %v1262_v30, 0 }
 0x1a1   :  { %v3163_v25 = vadd.s32 4294967294, %v1216_v2  ;;  %v4031_v5 = vmul.u32.u64.low %v3995_v8, %v1087_v58  ;;  %v4032_v22 = vmul.u32.u64.high %v3995_v8, %v1087_v58, %v4031_v5  ;;  %v1091_v11 = vsel %vm1077_vm4, %v1088_v16, %v1090_v41 }
 0x1a2   :  { %v1015_v9 = vor.u32 %v1014_v53, %v1013_v52  ;;  %v1018_v17 = vshll.u32 %v1017_v57, 23  ;;  %v4038_v14 = vmul.u32.u64.low %v3995_v8, %v1091_v11  ;;  %v4039_v63 = vmul.u32.u64.high %v3995_v8, %v1091_v11, %v4038_v14 }
 0x1a3   :  { %vm3164_vm7 = vcmp.lt.s32.totalorder %v3163_v25, 0  ;;  %v1264_v31 = vsel %vm1263_vm6, %v1262_v30, 0  ;;  %v1234_v28 = vsub.s32 4, %v3988_v62  ;;  %v1102_v49 = vadd.s32 1, %v4032_v22 }
 0x1a4   :  { %v1019_v10 = vor.u32 4788187, %v1018_v17  ;;  %v1022_v36 = vcvt.s32.f32 %v1015_v9  ;;  %v1219_v4 = vsel %vm3164_vm7, 0, %v3163_v25  ;;  %v1266_v23 = vand.u32 31, %v1264_v31 }
 0x1a5   :  { %v1220_v46 = vsub.s32 32, %v1219_v4  ;;  %v1224_v48 = vsub.s32 4294967266, %v1219_v4  ;;  %vm1150_vm8 = vcmp.lt.s32.totalorder %v3829_v54, 0  ;;  %v1099_v26 = vmul.u32 %v3995_v8, %v1083_v37  ;;  %v4056_v8 = vpop.f32.mrb[4].mxu0 }
 0x1a6   :  { %v1020_v19 = vand.u32 2147483647, %v1019_v10  ;;  %v4047_v35 = vand.u32 8388607, %v1252_v45  ;;  %v1221_v30 = vshll.u32 %v4006_v39, %v1219_v4  ;;  %vm1101_vm9 = vc.u32 %v4039_v63, %v4031_v5 }
 0x1a7   :  { %v1222_v51 = vshrl.u32 %v1204_v15, %v1220_v46  ;;  %v1225_v20 = vadd.s32 127, %v1224_v48  ;;  %v1033_v53 = vadd.s32 3, %v1029_v7  ;;  %v1235_v57 = vsel %vm1150_vm8, %v1234_v28, %v3988_v62 }
 0x1a8   :  { %v1023_v44 = vmul.f32 %v1022_v36, %v1020_v19  ;;  %v1103_v58 = vsel %vm1101_vm9, %v1102_v49, %v4032_v22  ;;  %v1267_v16 = vsub.s32 32, %v1266_v23  ;;  %vm4062_vm10 = vcmp.le.f32.partialorder %v1148_v56, 0.7853982 }
 0x1a9   :  { %v1223_v2 = vor.u32 %v1222_v51, %v1221_v30  ;;  %v1226_v3 = vshll.u32 %v1225_v20, 23  ;;  %v1104_v6 = vadd.s32 %v1103_v58, %v1099_v26  ;;  %v4069_v62 = vrot.slane %v3971_v21, %v3022_v24 }
 0x1aa   :  { %v1024_v52 = vxor.u32 2147483648, %v1023_v44  ;;  %v1260_v9 = vor.u32 8388608, %v4047_v35  ;;  %v1237_v25 = vsel %vm4062_vm10, 0, %v1235_v57  ;;  %v4077_v56 = vand.u32 3, %v1033_v53 }
 0x1ab   :  { %v1227_v12 = vor.u32 4788187, %v1226_v3  ;;  %v1105_v41 = vadd.s32 536870912, %v1104_v6  ;;  %v4079_v22 = vand.u32 3, %v1029_v7  ;;  %v1230_v10 = vcvt.s32.f32 %v1223_v2 }
 0x1ac   :  { %v1025_v39 = vsel %vm942_vm15, %v1024_v52, %v1023_v44  ;;  %v1279_v11 = vshrl.u32 %v3528_v40, %v1267_v16  ;;  %v1241_v14 = vadd.s32 3, %v1237_v25  ;;  %v1270_v1 = vshrl.u32 %v3525_v32, %v1267_v16 }
 0x1ad   :  { %v1028_v17 = vsel %vm3999_vm0, %v3831_v55, %v1025_v39  ;;  %v1228_v24 = vand.u32 2147483647, %v1227_v12  ;;  %v4081_v37 = vshrl.u32 %v1105_v41, 30  ;;  %v1276_v19 = vshrl.u32 %v3527_v38, %v1267_v16 }
 0x1ae   :  { %3384 = vcosq.f32 %v1028_v17  ;;  %v1278_v36 = vshll.u32 %v3527_v38, %v1266_v23  ;;  %v4088_v46 = vshrl.u32 %v1264_v31, 5  ;;  %v1273_v7 = vshrl.u32 %v3526_v34, %v1267_v16 }
 0x1af   :  { %3386 = vsinq.f32 %v1028_v17  ;;  %v1231_v4 = vmul.f32 %v1230_v10, %v1228_v24  ;;  %v1107_v28 = vshll.u32 %v4081_v37, 30  ;;  %vm1039_vm11 = vcmp.eq.s32.totalorder %v4077_v56, 2 }
 0x1b0   :  { %vm2078_vm12 = vcmp.eq.s32.totalorder %v4079_v22, 2  ;;  %v1269_v48 = vshll.u32 %v3524_v27, %v1266_v23  ;;  %v1275_v49 = vshll.u32 %v3526_v34, %v1266_v23  ;;  %v1280_v44 = vor.u32 %v1279_v11, %v1278_v36 }
 0x1b1   :  { %v1282_v26 = vshrl.u32 %v3529_v50, %v1267_v16  ;;  %vm1036_vm13 = vcmp.eq.s32.totalorder %v4077_v56, 0  ;;  %vm2075_vm14 = vcmp.eq.s32.totalorder %v4079_v22, 0  ;;  %v1232_v30 = vxor.u32 2147483648, %v1231_v4 }
 0x1b2   :  { %v4098_v31 = vand.u32 3, %v1237_v25  ;;  %v4100_v51 = vsub.s32 %v1104_v6, %v1107_v28  ;;  %v1272_v20 = vshll.u32 %v3525_v32, %v1266_v23  ;;  %vm1035_vm15 = vcmp.lt.s32.totalorder %v4077_v56, 2 }
 0x1b3   :  { %vm2074_vm0 = vcmp.lt.s32.totalorder %v4079_v22, 2  ;;  %vm3052_vm1 = vcmp.eq.s32.totalorder %v3976_v33, 1  ;;  %v4106_v52 = vand.u32 3, %v1241_v14  ;;  %v1271_v53 = vor.u32 %v1270_v1, %v1269_v48 }
 0x1b4   :  { %v1277_v57 = vor.u32 %v1276_v19, %v1275_v49  ;;  %v1281_v58 = vshll.u32 %v3528_v40, %v1266_v23  ;;  %vm1032_vm2 = vweird.f32 %v3831_v55  ;;  %v1233_v2 = vsel %vm1150_vm8, %v1232_v30, %v1231_v4 }
 0x1b5   :  { %v1110_v3 = vsub.s32 0, %v4100_v51  ;;  %v1274_v6 = vor.u32 %v1273_v7, %v1272_v20  ;;  %vm1287_vm3 = vcmp.lt.s32.totalorder %v4088_v46, 4  ;;  %v1236_v39 = vsel %vm4062_vm10, %v3829_v54, %v1233_v2 }
 0x1b6   :  { %v1100_v17 = vadd.s32 %v4031_v5, %v4039_v63  ;;  %v1283_v12 = vor.u32 %v1282_v26, %v1281_v58  ;;  %v1293_v23 = vsel %vm1287_vm3, %v1280_v44, 920167782  ;;  %3388 = vcosq.f32 %v1236_v39  ;;  %v4157_v58 = vpop.f32.mrb[5].mxu0 }
 0x1b7   :  { %v3158_v25 = vmin.u32 %v1110_v3, %v4100_v51  ;;  %v1268_v41 = vshrl.u32 %v3524_v27, %v1267_v16  ;;  %vm1284_vm4 = vcmp.lt.s32.totalorder %v4088_v46, 1  ;;  %3390 = vsinq.f32 %v1236_v39 }
 0x1b8   :  { %v3385_v10 = vpop.eup %3384  ;;  %vm1285_vm5 = vcmp.lt.s32.totalorder %v4088_v46, 2  ;;  %vm1286_vm6 = vcmp.lt.s32.totalorder %v4088_v46, 3  ;;  %v1289_v5 = vsel %vm1287_vm3, %v1277_v57, 2102212464  ;;  %v1292_v11 = vsel %vm1284_vm4, %v1271_v53, %v1274_v6 }
 0x1b9   :  { %v3387_v63 = vpop.eup %3386  ;;  %v1040_v15 = vxor.u32 2147483648, %v3385_v10  ;;  %v1112_v24 = vclz %v3158_v25  ;;  %v1294_v14 = vsel %vm1286_vm6, %v1277_v57, %v1293_v23  ;;  %v1288_v16 = vsel %vm1284_vm4, %v1268_v41, %v1271_v53 }
 0x1ba   :  { %v1037_v1 = vxor.u32 2147483648, %v3387_v63  ;;  %v1296_v19 = vsel %vm1284_vm4, %v1274_v6, %v1277_v57  ;;  %v1297_v36 = vsel %vm1287_vm3, %v1283_v12, 1326507024  ;;  %vm2284_vm7 = vcmp.eq.s32.totalorder %v4098_v31, 2 }
 0x1bb   :  { %v1041_v4 = vsel %vm1039_vm11, %v1040_v15, %v3387_v63  ;;  %v2080_v28 = vsel %vm2078_vm12, %v1040_v15, %v3387_v63  ;;  %vm1046_vm8 = vcmp.lt.s32.totalorder %v3837_v60, 0  ;;  %v3159_v7 = vadd.s32 4294967294, %v1112_v24 }
 0x1bc   :  { %v1298_v48 = vsel %vm1286_vm6, %v1280_v44, %v1297_v36  ;;  %v1038_v49 = vsel %vm1036_vm13, %v3385_v10, %v1037_v1  ;;  %v2077_v26 = vsel %vm2075_vm14, %v3385_v10, %v1037_v1  ;;  %vm2281_vm9 = vcmp.eq.s32.totalorder %v4098_v31, 0 }
 0x1bd   :  { %v1290_v30 = vsel %vm1286_vm6, %v1274_v6, %v1289_v5  ;;  %v1295_v20 = vsel %vm1285_vm5, %v1292_v11, %v1294_v14  ;;  %v1042_v53 = vsel %vm1035_vm15, %v1038_v49, %v1041_v4  ;;  %v2081_v44 = vsel %vm2074_vm0, %v2077_v26, %v2080_v28  ;;  %v923_v6 = vpop.f32.mrb[6].mxu0 }
 0x1be   :  { %vm2280_vm10 = vcmp.lt.s32.totalorder %v4098_v31, 2  ;;  %vm3054_vm11 = vcmp.eq.s32.totalorder %v4069_v62, 1  ;;  %vm3160_vm12 = vcmp.lt.s32.totalorder %v3159_v7, 0  ;;  %v1299_v57 = vsel %vm1285_vm5, %v1296_v19, %v1298_v48  ;;  %v924_v41 = vpop.f32.mrb[7].mxu0 }
 0x1bf   :  { %v1043_v2 = vsel %vm1032_vm2, nan, %v1042_v53  ;;  %v2082_v56 = vsel %vm1032_vm2, nan, %v2081_v44  ;;  %vm1240_vm13 = vweird.f32 %v3829_v54  ;;  %v1115_v22 = vsel %vm3160_vm12, 0, %v3159_v7 }
 0x1c0   :  { %v1300_v3 = vshll.u32 %v1260_v9, 8  ;;  %v3062_v39 = vsel %vm3052_vm1, %v1043_v2, %v2082_v56  ;;  %vm4170_vm14 = vcmp.le.f32.partialorder %v1044_v29, 0.7853982  ;;  %v1116_v23 = vsub.s32 32, %v1115_v22  ;;  %v3389_v33 = vpop.eup %3388 }
 0x1c1   :  { %v1120_v25 = vsub.s32 4294967266, %v1115_v22  ;;  %v1130_v55 = vsub.s32 4, %v4081_v37  ;;  %3072 = vst [vmem:[#allocation8] sm:$0xff] %v3062_v39  ;;  %v1117_v63 = vshll.u32 %v4100_v51, %v1115_v22  ;;  %v1291_v24 = vsel %vm1285_vm5, %v1288_v16, %v1290_v30  ;;  %v3391_v11 = vpop.eup %3390 }
 0x1c2   :  { %v4175_v10 = vmul.u32.u64.low %v1300_v3, %v1299_v57  ;;  %v4176_v5 = vmul.u32.u64.high %v1300_v3, %v1299_v57, %v4175_v10  ;;  %v4178_v35 = vmul.u32.u64.low %v1300_v3, %v1295_v20  ;;  %v4179_v9 = vmul.u32.u64.high %v1300_v3, %v1295_v20, %v4178_v35 }
 0x1c3   :  { %v1118_v29 = vshrl.u32 %v1100_v17, %v1116_v23  ;;  %v1121_v15 = vadd.s32 127, %v1120_v25  ;;  %vm1243_vm15 = vcmp.lt.s32.totalorder %v4106_v52, 2  ;;  %vm1244_vm0 = vcmp.eq.s32.totalorder %v4106_v52, 0 }
 0x1c4   :  { %v1248_v14 = vxor.u32 2147483648, %v3389_v33  ;;  %v1359_v1 = vand.u32 2139095040, %v3870_v42  ;;  %v1245_v19 = vxor.u32 2147483648, %v3391_v11  ;;  %vm1247_vm1 = vcmp.eq.s32.totalorder %v4106_v52, 2 }
 0x1c5   :  { %v1119_v36 = vor.u32 %v1118_v29, %v1117_v63  ;;  %v1122_v4 = vshll.u32 %v1121_v15, 23  ;;  %v1131_v46 = vsel %vm1046_vm8, %v1130_v55, %v4081_v37  ;;  %v1307_v17 = vmul.u32 %v1300_v3, %v1291_v24 }
 0x1c6   :  { %v1249_v28 = vsel %vm1247_vm1, %v1248_v14, %v3391_v11  ;;  %v2286_v51 = vsel %vm2284_vm7, %v1248_v14, %v3391_v11  ;;  %v1246_v16 = vsel %vm1244_vm0, %v3389_v33, %v1245_v19  ;;  %v2283_v7 = vsel %vm2281_vm9, %v3389_v33, %v1245_v19 }
 0x1c7   :  { %v1123_v48 = vor.u32 4788187, %v1122_v4  ;;  %vm1309_vm2 = vc.u32 %v4176_v5, %v4178_v35  ;;  %v1250_v49 = vsel %vm1243_vm15, %v1246_v16, %v1249_v28  ;;  %v2287_v26 = vsel %vm2280_vm10, %v2283_v7, %v2286_v51 }
 0x1c8   :  { %v1310_v30 = vadd.s32 1, %v4179_v9  ;;  %v1360_v20 = vshrl.u32 %v1359_v1, 23  ;;  %v1251_v37 = vsel %vm1240_vm13, nan, %v1250_v49  ;;  %v2288_v53 = vsel %vm1240_vm13, nan, %v2287_v26 }
 0x1c9   :  { %v1124_v44 = vand.u32 2147483647, %v1123_v48  ;;  %v1126_v57 = vcvt.s32.f32 %v1119_v36  ;;  %v3064_v2 = vsel %vm3054_vm11, %v1251_v37, %v2288_v53  ;;  %v1133_v52 = vsel %vm4170_vm14, 0, %v1131_v46 }
 0x1ca   :  { %v1311_v31 = vsel %vm1309_vm2, %v1310_v30, %v4179_v9  ;;  %v3169_v56 = vadd.s32 4294967169, %v1360_v20  ;;  %3074 = vst [vmem:[#allocation8 + $0x10] sm:$0xff] %v3064_v2  ;;  %v1356_v6 = vand.u32 2147483647, %v3870_v42  ;;  %v1137_v54 = vadd.s32 3, %v1133_v52 }
 0x1cb   :  { %v1127_v22 = vmul.f32 %v1126_v57, %v1124_v44  ;;  %v1312_v3 = vadd.s32 %v1311_v31, %v1307_v17  ;;  %v3018_v55 = vsub.s32 1, %v3952_v13  ;;  %v1567_v29 = vand.u32 2139095040, %v3872_v43 }
 0x1cc   :  { %v1366_v39 = vadd.s32 1, %v3169_v56  ;;  %v1363_v10 = vand.u32 8388607, %v1356_v6  ;;  %v4222_v15 = vand.u32 3, %v1137_v54  ;;  %v4224_v24 = vand.u32 3, %v1133_v52 }
 0x1cd   :  { %v1128_v23 = vxor.u32 2147483648, %v1127_v22  ;;  %v1313_v25 = vadd.s32 536870912, %v1312_v3  ;;  %v4229_v1 = vrot.slane %v3971_v21, %v3018_v55  ;;  %vm1254_vm4 = vcmp.lt.s32.totalorder %v3835_v59, 0 }
 0x1ce   :  { %vm1367_vm3 = vcmp.gt.s32.totalorder %v1366_v39, 0  ;;  %v1364_v19 = vor.u32 8388608, %v1363_v10  ;;  %v4236_v36 = vadd.s32 %v4178_v35, %v4176_v5  ;;  %v1568_v51 = vshrl.u32 %v1567_v29, 23 }
 0x1cf   :  { %v1129_v62 = vsel %vm1046_vm8, %v1128_v23, %v1127_v22  ;;  %v1314_v41 = vshrl.u32 %v1313_v25, 30  ;;  %v1368_v9 = vsel %vm1367_vm3, %v1366_v39, 0  ;;  %vm1143_vm5 = vcmp.eq.s32.totalorder %v4222_v15, 2 }
 0x1d0   :  { %v1132_v33 = vsel %vm4170_vm14, %v3837_v60, %v1129_v62  ;;  %v1370_v63 = vand.u32 31, %v1368_v9  ;;  %vm2181_vm6 = vcmp.eq.s32.totalorder %v4224_v24, 2  ;;  %v4243_v17 = vshrl.u32 %v1368_v9, 5 }
 0x1d1   :  { %3392 = vcosq.f32 %v1132_v33  ;;  %v1315_v11 = vshll.u32 %v1314_v41, 30  ;;  %vm1140_vm7 = vcmp.eq.s32.totalorder %v4222_v15, 0  ;;  %vm2178_vm8 = vcmp.eq.s32.totalorder %v4224_v24, 0 }
 0x1d2   :  { %3394 = vsinq.f32 %v1132_v33  ;;  %v1371_v14 = vsub.s32 32, %v1370_v63  ;;  %v1373_v16 = vshll.u32 %v3524_v27, %v1370_v63  ;;  %v1338_v5 = vsub.s32 4, %v1314_v41 }
 0x1d3   :  { %v4232_v12 = vsub.s32 %v1312_v3, %v1315_v11  ;;  %v1376_v35 = vshll.u32 %v3525_v32, %v1370_v63  ;;  %v1382_v48 = vshll.u32 %v3527_v38, %v1370_v63  ;;  %vm1139_vm9 = vcmp.lt.s32.totalorder %v4222_v15, 2 }
 0x1d4   :  { %v1374_v4 = vshrl.u32 %v3525_v32, %v1371_v14  ;;  %v1377_v28 = vshrl.u32 %v3526_v34, %v1371_v14  ;;  %v1380_v7 = vshrl.u32 %v3527_v38, %v1371_v14  ;;  %v1383_v49 = vshrl.u32 %v3528_v40, %v1371_v14 }
 0x1d5   :  { %v1318_v46 = vsub.s32 0, %v4232_v12  ;;  %vm2177_vm10 = vcmp.lt.s32.totalorder %v4224_v24, 2  ;;  %vm3053_vm11 = vcmp.eq.s32.totalorder %v4229_v1, 1  ;;  %v1379_v20 = vshll.u32 %v3526_v34, %v1370_v63 }
 0x1d6   :  { %v1375_v30 = vor.u32 %v1374_v4, %v1373_v16  ;;  %v4257_v37 = vshll.u32 %v1364_v19, 8  ;;  %vm1136_vm12 = vweird.f32 %v3837_v60  ;;  %v1378_v53 = vor.u32 %v1377_v28, %v1376_v35 }
 0x1d7   :  { %v3166_v26 = vmin.u32 %v1318_v46, %v4232_v12  ;;  %v1384_v44 = vor.u32 %v1383_v49, %v1382_v48  ;;  %v1385_v57 = vshll.u32 %v3528_v40, %v1370_v63  ;;  %v1386_v2 = vshrl.u32 %v3529_v50, %v1371_v14 }
 0x1d8   :  { %v1381_v31 = vor.u32 %v1380_v7, %v1379_v20  ;;  %v1564_v56 = vand.u32 2147483647, %v3872_v43  ;;  %v3177_v22 = vadd.s32 4294967169, %v1568_v51  ;;  %v1339_v3 = vsel %vm1254_vm4, %v1338_v5, %v1314_v41 }
 0x1d9   :  { %v1320_v52 = vclz %v3166_v26  ;;  %v1372_v39 = vshrl.u32 %v3524_v27, %v1371_v14  ;;  %v1387_v23 = vor.u32 %v1386_v2, %v1385_v57  ;;  %vm1388_vm13 = vcmp.lt.s32.totalorder %v4243_v17, 1 }
 0x1da   :  { %vm1389_vm14 = vcmp.lt.s32.totalorder %v4243_v17, 2  ;;  %vm1390_vm15 = vcmp.lt.s32.totalorder %v4243_v17, 3  ;;  %vm1391_vm0 = vcmp.lt.s32.totalorder %v4243_v17, 4  ;;  %v1396_v41 = vsel %vm1388_vm13, %v1375_v30, %v1378_v53 }
 0x1db   :  { %v3393_v54 = vpop.eup %3392  ;;  %v3167_v25 = vadd.s32 4294967294, %v1320_v52  ;;  %v1392_v9 = vsel %vm1388_vm13, %v1372_v39, %v1375_v30  ;;  %v1397_v33 = vsel %vm1391_vm0, %v1384_v44, 920167782  ;;  %v1393_v29 = vsel %vm1391_vm0, %v1381_v31, 2102212464 }
 0x1dc   :  { %v3395_v62 = vpop.eup %3394  ;;  %v1144_v10 = vxor.u32 2147483648, %v3393_v54  ;;  %v1398_v11 = vsel %vm1390_vm15, %v1381_v31, %v1397_v33  ;;  %v1400_v28 = vsel %vm1388_vm13, %v1378_v53, %v1381_v31  ;;  %v1394_v57 = vsel %vm1390_vm15, %v1378_v53, %v1393_v29 }
 0x1dd   :  { %v1141_v63 = vxor.u32 2147483648, %v3395_v62  ;;  %vm3168_vm1 = vcmp.lt.s32.totalorder %v3167_v25, 0  ;;  %v1399_v49 = vsel %vm1389_vm14, %v1396_v41, %v1398_v11  ;;  %vm4323_vm2 = vcmp.le.f32.partialorder %v1252_v45, 0.7853982 }
 0x1de   :  { %v1145_v14 = vsel %vm1143_vm5, %v1144_v10, %v3395_v62  ;;  %v2183_v19 = vsel %vm2181_vm6, %v1144_v10, %v3395_v62  ;;  %v1323_v4 = vsel %vm3168_vm1, 0, %v3167_v25  ;;  %v1571_v62 = vand.u32 8388607, %v1564_v56 }
 0x1df   :  { %v1142_v51 = vsel %vm1140_vm7, %v3393_v54, %v1141_v63  ;;  %v2180_v46 = vsel %vm2178_vm8, %v3393_v54, %v1141_v63  ;;  %v1324_v16 = vsub.s32 32, %v1323_v4  ;;  %v1325_v7 = vshll.u32 %v4232_v12, %v1323_v4 }
 0x1e0   :  { %v1146_v5 = vsel %vm1139_vm9, %v1142_v51, %v1145_v14  ;;  %v2184_v35 = vsel %vm2177_vm10, %v2180_v46, %v2183_v19  ;;  %v1328_v48 = vsub.s32 4294967266, %v1323_v4  ;;  %v1401_v12 = vsel %vm1391_vm0, %v1387_v23, 1326507024 }
 0x1e1   :  { %v1147_v26 = vsel %vm1136_vm12, nan, %v1146_v5  ;;  %v2185_v30 = vsel %vm1136_vm12, nan, %v2184_v35  ;;  %v1326_v20 = vshrl.u32 %v4236_v36, %v1324_v16  ;;  %v1402_v2 = vsel %vm1390_vm15, %v1384_v44, %v1401_v12 }
 0x1e2   :  { %v3063_v15 = vsel %vm3053_vm11, %v1147_v26, %v2185_v30  ;;  %v1329_v24 = vadd.s32 127, %v1328_v48  ;;  %v1403_v60 = vsel %vm1389_vm14, %v1400_v28, %v1402_v2  ;;  %v1574_v54 = vadd.s32 1, %v3177_v22 }
 0x1e3   :  { %3073 = vst [vmem:[#allocation8 + $0x8] sm:$0xff] %v3063_v15  ;;  %v1327_v52 = vor.u32 %v1326_v20, %v1325_v7  ;;  %v4313_v36 = vmul.u32.u64.low %v4257_v37, %v1399_v49  ;;  %v4314_v31 = vmul.u32.u64.high %v4257_v37, %v1399_v49, %v4313_v36  ;;  %v1395_v44 = vsel %vm1389_vm14, %v1392_v9, %v1394_v57 }
 0x1e4   :  { %v1330_v39 = vshll.u32 %v1329_v24, 23  ;;  %v4318_v1 = vmul.u32.u64.low %v4257_v37, %v1403_v60  ;;  %v4319_v23 = vmul.u32.u64.high %v4257_v37, %v1403_v60, %v4318_v1  ;;  %vm1575_vm3 = vcmp.gt.s32.totalorder %v1574_v54, 0 }
 0x1e5   :  { %v1341_v10 = vsel %vm4323_vm2, 0, %v1339_v3  ;;  %v1414_v41 = vadd.s32 1, %v4314_v31  ;;  %v1576_v22 = vsel %vm1575_vm3, %v1574_v54, 0  ;;  %v1334_v63 = vcvt.s32.f32 %v1327_v52 }
 0x1e6   :  { %v1331_v25 = vor.u32 4788187, %v1330_v39  ;;  %v1411_v45 = vmul.u32 %v4257_v37, %v1395_v44  ;;  %vm1413_vm5 = vc.u32 %v4319_v23, %v4313_v36  ;;  %v3026_v17 = vsub.s32 3, %v3952_v13 }
 0x1e7   :  { %v1415_v9 = vsel %vm1413_vm5, %v1414_v41, %v4314_v31  ;;  %v1578_v29 = vand.u32 31, %v1576_v22  ;;  %v1345_v14 = vadd.s32 3, %v1341_v10  ;;  %v1572_v4 = vor.u32 8388608, %v1571_v62 }
 0x1e8   :  { %v1332_v33 = vand.u32 2147483647, %v1331_v25  ;;  %v1416_v19 = vadd.s32 %v1415_v9, %v1411_v45  ;;  %v4339_v3 = vshrl.u32 %v1576_v22, 5  ;;  %v1463_v46 = vand.u32 2139095040, %v3877_v47 }
 0x1e9   :  { %v1579_v28 = vsub.s32 32, %v1578_v29  ;;  %v1581_v51 = vshll.u32 %v3524_v27, %v1578_v29  ;;  %v1584_v7 = vshll.u32 %v3525_v32, %v1578_v29  ;;  %v1587_v5 = vshll.u32 %v3526_v34, %v1578_v29 }
 0x1ea   :  { %v1335_v11 = vmul.f32 %v1334_v63, %v1332_v33  ;;  %v1417_v16 = vadd.s32 536870912, %v1416_v19  ;;  %v1590_v26 = vshll.u32 %v3527_v38, %v1578_v29  ;;  %v1593_v52 = vshll.u32 %v3528_v40, %v1578_v29 }
 0x1eb   :  { %v1582_v35 = vshrl.u32 %v3525_v32, %v1579_v28  ;;  %v1585_v48 = vshrl.u32 %v3526_v34, %v1579_v28  ;;  %v1588_v49 = vshrl.u32 %v3527_v38, %v1579_v28  ;;  %v1591_v12 = vshrl.u32 %v3528_v40, %v1579_v28 }
 0x1ec   :  { %v1336_v37 = vxor.u32 2147483648, %v1335_v11  ;;  %v4351_v20 = vshrl.u32 %v1417_v16, 30  ;;  %v1594_v15 = vshrl.u32 %v3529_v50, %v1579_v28  ;;  %v4360_v1 = vand.u32 3, %v1341_v10 }
 0x1ed   :  { %v1583_v57 = vor.u32 %v1582_v35, %v1581_v51  ;;  %v1589_v2 = vor.u32 %v1588_v49, %v1587_v5  ;;  %v1586_v31 = vor.u32 %v1585_v48, %v1584_v7  ;;  %v1592_v39 = vor.u32 %v1591_v12, %v1590_v26 }
 0x1ee   :  { %v1337_v30 = vsel %vm1254_vm4, %v1336_v37, %v1335_v11  ;;  %v1419_v60 = vshll.u32 %v4351_v20, 30  ;;  %v4363_v54 = vrot.slane %v3971_v21, %v3026_v17  ;;  %v1595_v44 = vor.u32 %v1594_v15, %v1593_v52 }
 0x1ef   :  { %v1340_v24 = vsel %vm4323_vm2, %v3835_v59, %v1337_v30  ;;  %v1346_v25 = vand.u32 3, %v1345_v14  ;;  %vm1599_vm4 = vcmp.lt.s32.totalorder %v4339_v3, 4  ;;  %v4368_v53 = vshll.u32 %v1572_v4, 8 }
 0x1f0   :  { %3396 = vcosq.f32 %v1340_v24  ;;  %v4365_v62 = vsub.s32 %v1416_v19, %v1419_v60  ;;  %vm1358_vm6 = vcmp.lt.s32.totalorder %v3870_v42, 0  ;;  %vm1596_vm7 = vcmp.lt.s32.totalorder %v4339_v3, 1 }
 0x1f1   :  { %3398 = vsinq.f32 %v1340_v24  ;;  %v1601_v41 = vsel %vm1599_vm4, %v1589_v2, 2102212464  ;;  %v1605_v22 = vsel %vm1599_vm4, %v1592_v39, 920167782  ;;  %v1464_v33 = vshrl.u32 %v1463_v46, 23 }
 0x1f2   :  { %v1422_v10 = vsub.s32 0, %v4365_v62  ;;  %v1580_v63 = vshrl.u32 %v3524_v27, %v1579_v28  ;;  %vm1598_vm8 = vcmp.lt.s32.totalorder %v4339_v3, 3  ;;  %v1604_v45 = vsel %vm1596_vm7, %v1583_v57, %v1586_v31 }
 0x1f3   :  { %vm2384_vm9 = vcmp.eq.s32.totalorder %v4360_v1, 0  ;;  %vm1597_vm10 = vcmp.lt.s32.totalorder %v4339_v3, 2  ;;  %v1606_v17 = vsel %vm1598_vm8, %v1589_v2, %v1605_v22  ;;  %v1609_v9 = vsel %vm1599_vm4, %v1595_v44, 1326507024 }
 0x1f4   :  { %vm2383_vm11 = vcmp.lt.s32.totalorder %v4360_v1, 2  ;;  %vm3055_vm12 = vcmp.eq.s32.totalorder %v4363_v54, 1  ;;  %v3170_v29 = vmin.u32 %v1422_v10, %v4365_v62  ;;  %v1600_v11 = vsel %vm1596_vm7, %v1580_v63, %v1583_v57 }
 0x1f5   :  { %v1602_v14 = vsel %vm1598_vm8, %v1586_v31, %v1601_v41  ;;  %v1608_v19 = vsel %vm1596_vm7, %v1586_v31, %v1589_v2  ;;  %vm1344_vm13 = vweird.f32 %v3835_v59  ;;  %vm2387_vm14 = vcmp.eq.s32.totalorder %v4360_v1, 2 }
 0x1f6   :  { %v1607_v4 = vsel %vm1597_vm10, %v1604_v45, %v1606_v17  ;;  %v1610_v28 = vsel %vm1598_vm8, %v1592_v39, %v1609_v9  ;;  %v3173_v51 = vadd.s32 4294967169, %v1464_v33  ;;  %vm1347_vm15 = vcmp.lt.s32.totalorder %v1346_v25, 2 }
 0x1f7   :  { %vm1348_vm0 = vcmp.eq.s32.totalorder %v1346_v25, 0  ;;  %v1424_v46 = vclz %v3170_v29  ;;  %v1442_v37 = vsub.s32 4, %v4351_v20  ;;  %v1603_v16 = vsel %vm1597_vm10, %v1600_v11, %v1602_v14 }
 0x1f8   :  { %v1611_v7 = vsel %vm1597_vm10, %v1608_v19, %v1610_v28  ;;  %v4396_v5 = vmul.u32.u64.low %v4368_v53, %v1607_v4  ;;  %v4397_v35 = vmul.u32.u64.high %v4368_v53, %v1607_v4, %v4396_v5  ;;  %v1470_v12 = vadd.s32 1, %v3173_v51 }
 0x1f9   :  { %v3171_v49 = vadd.s32 4294967294, %v1424_v46  ;;  %v4401_v26 = vmul.u32.u64.low %v4368_v53, %v1611_v7  ;;  %v4402_v30 = vmul.u32.u64.high %v4368_v53, %v1611_v7, %v4401_v26  ;;  %vm1351_vm1 = vcmp.eq.s32.totalorder %v1346_v25, 2 }
 0x1fa   :  { %v3397_v48 = vpop.eup %3396  ;;  %v1412_v57 = vadd.s32 %v4313_v36, %v4319_v23  ;;  %v1460_v3 = vand.u32 2147483647, %v3877_v47  ;;  %v1443_v52 = vsel %vm1358_vm6, %v1442_v37, %v4351_v20  ;;  %v1619_v60 = vmul.u32 %v4368_v53, %v1603_v16 }
 0x1fb   :  { %v3399_v15 = vpop.eup %3398  ;;  %v1352_v24 = vxor.u32 2147483648, %v3397_v48  ;;  %vm3172_vm2 = vcmp.lt.s32.totalorder %v3171_v49, 0  ;;  %v1622_v41 = vadd.s32 1, %v4397_v35  ;;  %vm1471_vm3 = vcmp.gt.s32.totalorder %v1470_v12, 0 }
 0x1fc   :  { %v1349_v2 = vxor.u32 2147483648, %v3399_v15  ;;  %v1427_v44 = vsel %vm3172_vm2, 0, %v3171_v49  ;;  %vm1621_vm5 = vc.u32 %v4402_v30, %v4396_v5  ;;  %v1472_v29 = vsel %vm1471_vm3, %v1470_v12, 0 }
 0x1fd   :  { %v1353_v31 = vsel %vm1351_vm1, %v1352_v24, %v3399_v15  ;;  %v2389_v39 = vsel %vm2387_vm14, %v1352_v24, %v3399_v15  ;;  %v1428_v23 = vsub.s32 32, %v1427_v44  ;;  %v1429_v53 = vshll.u32 %v4365_v62, %v1427_v44 }
 0x1fe   :  { %v1350_v22 = vsel %vm1348_vm0, %v3397_v48, %v1349_v2  ;;  %v2386_v36 = vsel %vm2384_vm9, %v3397_v48, %v1349_v2  ;;  %v1432_v10 = vsub.s32 4294967266, %v1427_v44  ;;  %v1623_v1 = vsel %vm1621_vm5, %v1622_v41, %v4397_v35 }
 0x1ff   :  { %v1354_v33 = vsel %vm1347_vm15, %v1350_v22, %v1353_v31  ;;  %v2390_v20 = vsel %vm2383_vm11, %v2386_v36, %v2389_v39  ;;  %v1430_v17 = vshrl.u32 %v1412_v57, %v1428_v23  ;;  %v3030_v62 = vsub.s32 4, %v3952_v13 }
 0x200   :  { %v1355_v63 = vsel %vm1344_vm13, nan, %v1354_v33  ;;  %v2391_v45 = vsel %vm1344_vm13, nan, %v2390_v20  ;;  %v1433_v9 = vadd.s32 127, %v1432_v10  ;;  %v1624_v11 = vadd.s32 %v1623_v1, %v1619_v60 }
 0x201   :  { %v3065_v25 = vsel %vm3055_vm12, %v1355_v63, %v2391_v45  ;;  %v1474_v14 = vand.u32 31, %v1472_v29  ;;  %vm4433_vm4 = vcmp.le.f32.partialorder %v1356_v6, 0.7853982  ;;  %v1431_v19 = vor.u32 %v1430_v17, %v1429_v53 }
 0x202   :  { %3075 = vst [vmem:[#allocation8 + $0x18] sm:$0xff] %v3065_v25  ;;  %v1434_v4 = vshll.u32 %v1433_v9, 23  ;;  %v1445_v54 = vsel %vm4433_vm4, 0, %v1443_v52  ;;  %v1625_v28 = vadd.s32 536870912, %v1624_v11  ;;  %v1467_v37 = vand.u32 8388607, %v1460_v3 }
 0x203   :  { %v1475_v51 = vsub.s32 32, %v1474_v14  ;;  %v4442_v16 = vrot.slane %v3971_v21, %v3030_v62  ;;  %v1438_v35 = vcvt.s32.f32 %v1431_v19  ;;  %v1449_v48 = vadd.s32 3, %v1445_v54 }
 0x204   :  { %v1435_v46 = vor.u32 4788187, %v1434_v4  ;;  %v4444_v7 = vshrl.u32 %v1625_v28, 30  ;;  %v4446_v49 = vand.u32 3, %v1445_v54  ;;  %v1468_v2 = vor.u32 8388608, %v1467_v37 }
 0x205   :  { %v1478_v12 = vshrl.u32 %v3525_v32, %v1475_v51  ;;  %v1481_v15 = vshrl.u32 %v3526_v34, %v1475_v51  ;;  %v1484_v24 = vshrl.u32 %v3527_v38, %v1475_v51  ;;  %v1477_v52 = vshll.u32 %v3524_v27, %v1474_v14 }
 0x206   :  { %v1436_v6 = vand.u32 2147483647, %v1435_v46  ;;  %v1627_v26 = vshll.u32 %v4444_v7, 30  ;;  %v1487_v60 = vshrl.u32 %v3528_v40, %v1475_v51  ;;  %v1480_v39 = vshll.u32 %v3525_v32, %v1474_v14 }
 0x207   :  { %v1483_v44 = vshll.u32 %v3526_v34, %v1474_v14  ;;  %v1490_v41 = vshrl.u32 %v3529_v50, %v1475_v51  ;;  %v1473_v36 = vshrl.u32 %v1472_v29, 5  ;;  %v1486_v23 = vshll.u32 %v3527_v38, %v1474_v14 }
 0x208   :  { %v1439_v57 = vmul.f32 %v1438_v35, %v1436_v6  ;;  %v4454_v31 = vsub.s32 %v1624_v11, %v1627_v26  ;;  %v1489_v33 = vshll.u32 %v3528_v40, %v1474_v14  ;;  %v1479_v53 = vor.u32 %v1478_v12, %v1477_v52 }
 0x209   :  { %v1482_v10 = vor.u32 %v1481_v15, %v1480_v39  ;;  %v1485_v63 = vor.u32 %v1484_v24, %v1483_v44  ;;  %v4464_v17 = vand.u32 3, %v1449_v48  ;;  %v1488_v25 = vor.u32 %v1487_v60, %v1486_v23 }
 0x20a   :  { %v1440_v22 = vxor.u32 2147483648, %v1439_v57  ;;  %v1630_v20 = vsub.s32 0, %v4454_v31  ;;  %v4466_v9 = vshll.u32 %v1468_v2, 8  ;;  %vm1566_vm7 = vcmp.lt.s32.totalorder %v3872_v43, 0 }
 0x20b   :  { %v1476_v62 = vshrl.u32 %v3524_v27, %v1475_v51  ;;  %v1491_v11 = vor.u32 %v1490_v41, %v1489_v33  ;;  %v1650_v14 = vsub.s32 4, %v4444_v7  ;;  %vm1495_vm8 = vcmp.lt.s32.totalorder %v1473_v36, 4 }
 0x20c   :  { %v1441_v45 = vsel %vm1358_vm6, %v1440_v22, %v1439_v57  ;;  %v3178_v29 = vmin.u32 %v1630_v20, %v4454_v31  ;;  %vm1492_vm6 = vcmp.lt.s32.totalorder %v1473_v36, 1  ;;  %v1497_v4 = vsel %vm1495_vm8, %v1485_v63, 2102212464 }
 0x20d   :  { %v1444_v1 = vsel %vm4433_vm4, %v3870_v42, %v1441_v45  ;;  %v1500_v54 = vsel %vm1492_vm6, %v1479_v53, %v1482_v10  ;;  %vm1493_vm9 = vcmp.lt.s32.totalorder %v1473_v36, 2  ;;  %vm1494_vm10 = vcmp.lt.s32.totalorder %v1473_v36, 3 }
 0x20e   :  { %3400 = vcosq.f32 %v1444_v1  ;;  %v1632_v19 = vclz %v3178_v29  ;;  %v1501_v59 = vsel %vm1495_vm8, %v1488_v25, 920167782  ;;  %v1504_v28 = vsel %vm1492_vm6, %v1482_v10, %v1485_v63 }
 0x20f   :  { %3402 = vsinq.f32 %v1444_v1  ;;  %vm4477_vm11 = vcmp.le.f32.partialorder %v1564_v56, 0.7853982  ;;  %v1496_v37 = vsel %vm1492_vm6, %v1476_v62, %v1479_v53  ;;  %v1502_v6 = vsel %vm1494_vm10, %v1485_v63, %v1501_v59 }
 0x210   :  { %v3179_v51 = vadd.s32 4294967294, %v1632_v19  ;;  %v1505_v35 = vsel %vm1495_vm8, %v1491_v11, 1326507024  ;;  %vm2490_vm12 = vcmp.eq.s32.totalorder %v4446_v49, 2  ;;  %v1498_v48 = vsel %vm1494_vm10, %v1482_v10, %v1497_v4 }
 0x211   :  { %v1503_v26 = vsel %vm1493_vm9, %v1500_v54, %v1502_v6  ;;  %v1506_v12 = vsel %vm1494_vm10, %v1488_v25, %v1505_v35  ;;  %v1671_v15 = vand.u32 2139095040, %v3882_v61  ;;  %vm2487_vm13 = vcmp.eq.s32.totalorder %v4446_v49, 0 }
 0x212   :  { %vm3180_vm14 = vcmp.lt.s32.totalorder %v3179_v51, 0  ;;  %v1507_v56 = vsel %vm1493_vm9, %v1504_v28, %v1506_v12  ;;  %v4487_v24 = vmul.u32.u64.low %v4466_v9, %v1503_v26  ;;  %v4488_v57 = vmul.u32.u64.high %v4466_v9, %v1503_v26, %v4487_v24 }
 0x213   :  { %vm1451_vm15 = vcmp.lt.s32.totalorder %v4464_v17, 2  ;;  %vm2486_vm0 = vcmp.lt.s32.totalorder %v4446_v49, 2  ;;  %vm3056_vm1 = vcmp.eq.s32.totalorder %v4442_v16, 1  ;;  %v1635_v2 = vsel %vm3180_vm14, 0, %v3179_v51 }
 0x214   :  { %v4495_v52 = vmul.u32.u64.low %v4466_v9, %v1507_v56  ;;  %v4496_v60 = vmul.u32.u64.high %v4466_v9, %v1507_v56, %v4495_v52  ;;  %v1672_v39 = vshrl.u32 %v1671_v15, 23  ;;  %vm1448_vm2 = vweird.f32 %v3870_v42 }
 0x215   :  { %v1620_v44 = vadd.s32 %v4396_v5, %v4402_v30  ;;  %v1636_v41 = vsub.s32 32, %v1635_v2  ;;  %v1640_v22 = vsub.s32 4294967266, %v1635_v2  ;;  %v1499_v23 = vsel %vm1493_vm9, %v1496_v37, %v1498_v48 }
 0x216   :  { %vm1452_vm3 = vcmp.eq.s32.totalorder %v4464_v17, 0  ;;  %v1651_v33 = vsel %vm1566_vm7, %v1650_v14, %v4444_v7  ;;  %v1668_v20 = vand.u32 2147483647, %v3882_v61  ;;  %v3181_v53 = vadd.s32 4294967169, %v1672_v39 }
 0x217   :  { %v1637_v10 = vshll.u32 %v4454_v31, %v1635_v2  ;;  %v1638_v63 = vshrl.u32 %v1620_v44, %v1636_v41  ;;  %v1641_v45 = vadd.s32 127, %v1640_v22  ;;  %v1518_v25 = vadd.s32 1, %v4488_v57 }
 0x218   :  { %v3401_v5 = vpop.eup %3400  ;;  %vm1455_vm5 = vcmp.eq.s32.totalorder %v4464_v17, 2  ;;  %v1515_v30 = vmul.u32 %v4466_v9, %v1499_v23  ;;  %vm1517_vm4 = vc.u32 %v4496_v60, %v4487_v24  ;;  %v1678_v36 = vadd.s32 1, %v3181_v53 }
 0x219   :  { %v3403_v1 = vpop.eup %3402  ;;  %v1456_v7 = vxor.u32 2147483648, %v3401_v5  ;;  %v1639_v29 = vor.u32 %v1638_v63, %v1637_v10  ;;  %v1642_v62 = vshll.u32 %v1641_v45, 23  ;;  %v1519_v11 = vsel %vm1517_vm4, %v1518_v25, %v4488_v57 }
 0x21a   :  { %v1453_v31 = vxor.u32 2147483648, %v3403_v1  ;;  %v1653_v14 = vsel %vm4477_vm11, 0, %v1651_v33  ;;  %v1520_v19 = vadd.s32 %v1519_v11, %v1515_v30  ;;  %vm1679_vm6 = vcmp.gt.s32.totalorder %v1678_v36, 0 }
 0x21b   :  { %v1457_v4 = vsel %vm1455_vm5, %v1456_v7, %v3403_v1  ;;  %v2492_v9 = vsel %vm2490_vm12, %v1456_v7, %v3403_v1  ;;  %v1643_v54 = vor.u32 4788187, %v1642_v62  ;;  %v1675_v59 = vand.u32 8388607, %v1668_v20 }
 0x21c   :  { %v1454_v28 = vsel %vm1452_vm3, %v3401_v5, %v1453_v31  ;;  %v2489_v51 = vsel %vm2487_vm13, %v3401_v5, %v1453_v31  ;;  %v1521_v37 = vadd.s32 536870912, %v1520_v19  ;;  %v1680_v6 = vsel %vm1679_vm6, %v1678_v36, 0 }
 0x21d   :  { %v1458_v35 = vsel %vm1451_vm15, %v1454_v28, %v1457_v4  ;;  %v2493_v48 = vsel %vm2486_vm0, %v2489_v51, %v2492_v9  ;;  %v1644_v26 = vand.u32 2147483647, %v1643_v54  ;;  %v1646_v12 = vcvt.s32.f32 %v1639_v29 }
 0x21e   :  { %v1459_v15 = vsel %vm1448_vm2, nan, %v1458_v35  ;;  %v2494_v56 = vsel %vm1448_vm2, nan, %v2493_v48  ;;  %v4532_v57 = vshrl.u32 %v1521_v37, 30  ;;  %v1682_v2 = vand.u32 31, %v1680_v6 }
 0x21f   :  { %v3066_v52 = vsel %vm3056_vm1, %v1459_v15, %v2494_v56  ;;  %v1647_v39 = vmul.f32 %v1646_v12, %v1644_v26  ;;  %v1657_v41 = vadd.s32 3, %v1653_v14  ;;  %v3038_v22 = vsub.s32 6, %v3952_v13 }
 0x220   :  { %3076 = vst [vmem:[#allocation8 + $0x20] sm:$0xff] %v3066_v52  ;;  %v1523_v17 = vshll.u32 %v4532_v57, 30  ;;  %v1683_v49 = vsub.s32 32, %v1682_v2  ;;  %v1676_v33 = vor.u32 8388608, %v1675_v59  ;;  %v4543_v10 = vshrl.u32 %v1680_v6, 5 }
 0x221   :  { %v1648_v44 = vxor.u32 2147483648, %v1647_v39  ;;  %v1685_v5 = vshll.u32 %v3524_v27, %v1682_v2  ;;  %v1688_v30 = vshll.u32 %v3525_v32, %v1682_v2  ;;  %v4553_v36 = vand.u32 3, %v1657_v41 }
 0x222   :  { %v4538_v23 = vsub.s32 %v1520_v19, %v1523_v17  ;;  %v1686_v42 = vshrl.u32 %v3525_v32, %v1683_v49  ;;  %v1689_v16 = vshrl.u32 %v3526_v34, %v1683_v49  ;;  %v1692_v63 = vshrl.u32 %v3527_v38, %v1683_v49 }
 0x223   :  { %v1649_v53 = vsel %vm1566_vm7, %v1648_v44, %v1647_v39  ;;  %v4555_v1 = vand.u32 3, %v1653_v14  ;;  %v1691_v7 = vshll.u32 %v3526_v34, %v1682_v2  ;;  %vm1462_vm7 = vcmp.lt.s32.totalorder %v3877_v47, 0 }
 0x224   :  { %v1652_v45 = vsel %vm4477_vm11, %v3872_v43, %v1649_v53  ;;  %v1526_v25 = vsub.s32 0, %v4538_v23  ;;  %v1687_v46 = vor.u32 %v1686_v42, %v1685_v5  ;;  %v1690_v62 = vor.u32 %v1689_v16, %v1688_v30 }
 0x225   :  { %3404 = vcosq.f32 %v1652_v45  ;;  %v4561_v11 = vrot.slane %v3971_v21, %v3038_v22  ;;  %v1693_v31 = vor.u32 %v1692_v63, %v1691_v7  ;;  %v1694_v19 = vshll.u32 %v3527_v38, %v1682_v2 }
 0x226   :  { %3406 = vsinq.f32 %v1652_v45  ;;  %v3174_v29 = vmin.u32 %v1526_v25, %v4538_v23  ;;  %v1695_v4 = vshrl.u32 %v3528_v40, %v1683_v49  ;;  %v1516_v14 = vadd.s32 %v4487_v24, %v4496_v60 }
 0x227   :  { %vm1700_vm8 = vcmp.lt.s32.totalorder %v4543_v10, 1  ;;  %v4568_v54 = vshll.u32 %v1676_v33, 8  ;;  %vm1663_vm9 = vcmp.eq.s32.totalorder %v4553_v36, 2  ;;  %vm2696_vm10 = vcmp.eq.s32.totalorder %v4555_v1, 2 }
 0x228   :  { %v1528_v9 = vclz %v3174_v29  ;;  %v1546_v59 = vsub.s32 4, %v4532_v57  ;;  %v1696_v28 = vor.u32 %v1695_v4, %v1694_v19  ;;  %v1697_v51 = vshll.u32 %v3528_v40, %v1682_v2 }
 0x229   :  { %v1698_v37 = vshrl.u32 %v3529_v50, %v1683_v49  ;;  %vm1660_vm11 = vcmp.eq.s32.totalorder %v4553_v36, 0  ;;  %vm2693_vm12 = vcmp.eq.s32.totalorder %v4555_v1, 0  ;;  %v1684_v60 = vshrl.u32 %v3524_v27, %v1683_v49 }
 0x22a   :  { %v3175_v24 = vadd.s32 4294967294, %v1528_v9  ;;  %vm1703_vm13 = vcmp.lt.s32.totalorder %v4543_v10, 4  ;;  %v1708_v6 = vsel %vm1700_vm8, %v1687_v46, %v1690_v62  ;;  %vm1659_vm14 = vcmp.lt.s32.totalorder %v4553_v36, 2 }
 0x22b   :  { %vm2692_vm15 = vcmp.lt.s32.totalorder %v4555_v1, 2  ;;  %vm3058_vm0 = vcmp.eq.s32.totalorder %v4561_v11, 1  ;;  %v1699_v35 = vor.u32 %v1698_v37, %v1697_v51  ;;  %vm1702_vm1 = vcmp.lt.s32.totalorder %v4543_v10, 3 }
 0x22c   :  { %v1705_v48 = vsel %vm1703_vm13, %v1693_v31, 2102212464  ;;  %v1709_v26 = vsel %vm1703_vm13, %v1696_v28, 920167782  ;;  %vm1656_vm2 = vweird.f32 %v3872_v43  ;;  %vm3176_vm3 = vcmp.lt.s32.totalorder %v3175_v24, 0 }
 0x22d   :  { %vm1701_vm5 = vcmp.lt.s32.totalorder %v4543_v10, 2  ;;  %v1710_v12 = vsel %vm1702_vm1, %v1693_v31, %v1709_v26  ;;  %v1712_v15 = vsel %vm1700_vm8, %v1690_v62, %v1693_v31  ;;  %v1531_v56 = vsel %vm3176_vm3, 0, %v3175_v24 }
 0x22e   :  { %v1704_v2 = vsel %vm1700_vm8, %v1684_v60, %v1687_v46  ;;  %v1711_v52 = vsel %vm1701_vm5, %v1708_v6, %v1710_v12  ;;  %v1713_v39 = vsel %vm1703_vm13, %v1699_v35, 1326507024  ;;  %v1532_v17 = vsub.s32 32, %v1531_v56 }
 0x22f   :  { %v1536_v49 = vsub.s32 4294967266, %v1531_v56  ;;  %v1706_v44 = vsel %vm1702_vm1, %v1690_v62, %v1705_v48  ;;  %v1714_v41 = vsel %vm1702_vm1, %v1696_v28, %v1713_v39  ;;  %v3405_v22 = vpop.eup %3404  ;;  %v1547_v33 = vsel %vm1462_vm7, %v1546_v59, %v4532_v57 }
 0x230   :  { %v1715_v42 = vsel %vm1701_vm5, %v1712_v15, %v1714_v41  ;;  %v4605_v53 = vmul.u32.u64.low %v4568_v54, %v1711_v52  ;;  %v4606_v16 = vmul.u32.u64.high %v4568_v54, %v1711_v52, %v4605_v53  ;;  %v3407_v63 = vpop.eup %3406  ;;  %v1664_v45 = vxor.u32 2147483648, %v3405_v22 }
 0x231   :  { %v1533_v25 = vshll.u32 %v4538_v23, %v1531_v56  ;;  %v1534_v5 = vshrl.u32 %v1516_v14, %v1532_v17  ;;  %v1537_v30 = vadd.s32 127, %v1536_v49  ;;  %v1661_v7 = vxor.u32 2147483648, %v3407_v63 }
 0x232   :  { %v1707_v29 = vsel %vm1701_vm5, %v1704_v2, %v1706_v44  ;;  %v4613_v57 = vmul.u32.u64.low %v4568_v54, %v1715_v42  ;;  %v4614_v46 = vmul.u32.u64.high %v4568_v54, %v1715_v42, %v4613_v57  ;;  %v1665_v62 = vsel %vm1663_vm9, %v1664_v45, %v3407_v63 }
 0x233   :  { %v2698_v31 = vsel %vm2696_vm10, %v1664_v45, %v3407_v63  ;;  %v1535_v19 = vor.u32 %v1534_v5, %v1533_v25  ;;  %v1538_v4 = vshll.u32 %v1537_v30, 23  ;;  %v1662_v23 = vsel %vm1660_vm11, %v3405_v22, %v1661_v7 }
 0x234   :  { %v2695_v14 = vsel %vm2693_vm12, %v3405_v22, %v1661_v7  ;;  %v1726_v10 = vadd.s32 1, %v4606_v16  ;;  %v1775_v9 = vand.u32 2139095040, %v4056_v8  ;;  %v1666_v59 = vsel %vm1659_vm14, %v1662_v23, %v1665_v62 }
 0x235   :  { %v2699_v28 = vsel %vm2692_vm15, %v2695_v14, %v2698_v31  ;;  %v1539_v51 = vor.u32 4788187, %v1538_v4  ;;  %v1723_v37 = vmul.u32 %v4568_v54, %v1707_v29  ;;  %v1667_v24 = vsel %vm1656_vm2, nan, %v1666_v59 }
 0x236   :  { %v2700_v60 = vsel %vm1656_vm2, nan, %v2699_v28  ;;  %v1542_v6 = vcvt.s32.f32 %v1535_v19  ;;  %vm1725_vm4 = vc.u32 %v4614_v46, %v4605_v53  ;;  %v1776_v48 = vshrl.u32 %v1775_v9, 23 }
 0x237   :  { %v3068_v36 = vsel %vm3058_vm0, %v1667_v24, %v2700_v60  ;;  %v1540_v35 = vand.u32 2147483647, %v1539_v51  ;;  %v1727_v1 = vsel %vm1725_vm4, %v1726_v10, %v4606_v16  ;;  %vm4642_vm6 = vcmp.le.f32.partialorder %v1460_v3, 0.7853982 }
 0x238   :  { %3078 = vst [vmem:[#allocation8 + $0x30] sm:$0xff] %v3068_v36  ;;  %v1728_v43 = vadd.s32 %v1727_v1, %v1723_v37  ;;  %v1549_v12 = vsel %vm4642_vm6, 0, %v1547_v33  ;;  %v1772_v15 = vand.u32 2147483647, %v4056_v8  ;;  %v3185_v11 = vadd.s32 4294967169, %v1776_v48 }
 0x239   :  { %v1543_v26 = vmul.f32 %v1542_v6, %v1540_v35  ;;  %v1553_v39 = vadd.s32 3, %v1549_v12  ;;  %v3034_v17 = vsub.s32 5, %v3952_v13  ;;  %v1879_v41 = vand.u32 2139095040, %v4157_v58 }
 0x23a   :  { %v1729_v56 = vadd.s32 536870912, %v1728_v43  ;;  %v1782_v52 = vadd.s32 1, %v3185_v11  ;;  %v1779_v44 = vand.u32 8388607, %v1772_v15  ;;  %v4661_v16 = vand.u32 3, %v1549_v12 }
 0x23b   :  { %v1544_v2 = vxor.u32 2147483648, %v1543_v26  ;;  %v1554_v45 = vand.u32 3, %v1553_v39  ;;  %v4666_v5 = vrot.slane %v3971_v21, %v3034_v17  ;;  %v1880_v29 = vshrl.u32 %v1879_v41, 23 }
 0x23c   :  { %v4650_v49 = vshrl.u32 %v1729_v56, 30  ;;  %vm1783_vm8 = vcmp.gt.s32.totalorder %v1782_v52, 0  ;;  %v1780_v30 = vor.u32 8388608, %v1779_v44  ;;  %vm2590_vm10 = vcmp.eq.s32.totalorder %v4661_v16, 0 }
 0x23d   :  { %v1545_v3 = vsel %vm1462_vm7, %v1544_v2, %v1543_v26  ;;  %v1784_v42 = vsel %vm1783_vm8, %v1782_v52, 0  ;;  %vm2593_vm7 = vcmp.eq.s32.totalorder %v4661_v16, 2  ;;  %vm1556_vm9 = vcmp.eq.s32.totalorder %v1554_v45, 0 }
 0x23e   :  { %v1548_v22 = vsel %vm4642_vm6, %v3877_v47, %v1545_v3  ;;  %v1731_v33 = vshll.u32 %v4650_v49, 30  ;;  %v1786_v63 = vand.u32 31, %v1784_v42  ;;  %v4670_v62 = vshrl.u32 %v1784_v42, 5 }
 0x23f   :  { %3408 = vcosq.f32 %v1548_v22  ;;  %vm1555_vm11 = vcmp.lt.s32.totalorder %v1554_v45, 2  ;;  %vm1559_vm12 = vcmp.eq.s32.totalorder %v1554_v45, 2  ;;  %vm2589_vm13 = vcmp.lt.s32.totalorder %v4661_v16, 2 }
 0x240   :  { %3410 = vsinq.f32 %v1548_v22  ;;  %v4663_v25 = vsub.s32 %v1728_v43, %v1731_v33  ;;  %v1787_v7 = vsub.s32 32, %v1786_v63  ;;  %v1789_v14 = vshll.u32 %v3524_v27, %v1786_v63 }
 0x241   :  { %v1792_v10 = vshll.u32 %v3525_v32, %v1786_v63  ;;  %v1795_v9 = vshll.u32 %v3526_v34, %v1786_v63  ;;  %vm3057_vm14 = vcmp.eq.s32.totalorder %v4666_v5, 1  ;;  %v1724_v59 = vadd.s32 %v4605_v53, %v4614_v46 }
 0x242   :  { %v1734_v57 = vsub.s32 0, %v4663_v25  ;;  %v1790_v31 = vshrl.u32 %v3525_v32, %v1787_v7  ;;  %v1793_v19 = vshrl.u32 %v3526_v34, %v1787_v7  ;;  %v1796_v4 = vshrl.u32 %v3527_v38, %v1787_v7 }
 0x243   :  { %v4684_v28 = vshll.u32 %v1780_v30, 8  ;;  %v3189_v51 = vadd.s32 4294967169, %v1880_v29  ;;  %vm1552_vm15 = vweird.f32 %v3877_v47  ;;  %v1798_v36 = vshll.u32 %v3527_v38, %v1786_v63 }
 0x244   :  { %v3182_v23 = vmin.u32 %v1734_v57, %v4663_v25  ;;  %v1791_v24 = vor.u32 %v1790_v31, %v1789_v14  ;;  %v1794_v60 = vor.u32 %v1793_v19, %v1792_v10  ;;  %v1797_v6 = vor.u32 %v1796_v4, %v1795_v9 }
 0x245   :  { %v1799_v35 = vshrl.u32 %v3528_v40, %v1787_v7  ;;  %v1801_v1 = vshll.u32 %v3528_v40, %v1786_v63  ;;  %v1802_v48 = vshrl.u32 %v3529_v50, %v1787_v7  ;;  %v1788_v53 = vshrl.u32 %v3524_v27, %v1787_v7 }
 0x246   :  { %v1736_v37 = vclz %v3182_v23  ;;  %vm1804_vm0 = vcmp.lt.s32.totalorder %v4670_v62, 1  ;;  %vm1805_vm1 = vcmp.lt.s32.totalorder %v4670_v62, 2  ;;  %vm1806_vm2 = vcmp.lt.s32.totalorder %v4670_v62, 3 }
 0x247   :  { %v1800_v43 = vor.u32 %v1799_v35, %v1798_v36  ;;  %v1803_v26 = vor.u32 %v1802_v48, %v1801_v1  ;;  %vm1807_vm3 = vcmp.lt.s32.totalorder %v4670_v62, 4  ;;  %v1808_v56 = vsel %vm1804_vm0, %v1788_v53, %v1791_v24 }
 0x248   :  { %v3183_v54 = vadd.s32 4294967294, %v1736_v37  ;;  %v1809_v2 = vsel %vm1807_vm3, %v1797_v6, 2102212464  ;;  %v1812_v17 = vsel %vm1804_vm0, %v1791_v24, %v1794_v60  ;;  %v1816_v16 = vsel %vm1804_vm0, %v1794_v60, %v1797_v6 }
 0x249   :  { %v3409_v46 = vpop.eup %3408  ;;  %v1813_v3 = vsel %vm1807_vm3, %v1800_v43, 920167782  ;;  %v1810_v33 = vsel %vm1806_vm2, %v1794_v60, %v1809_v2  ;;  %v1817_v9 = vsel %vm1807_vm3, %v1803_v26, 1326507024  ;;  %v1876_v36 = vand.u32 2147483647, %v4157_v58 }
 0x24a   :  { %v3411_v12 = vpop.eup %3410  ;;  %v1560_v11 = vxor.u32 2147483648, %v3409_v46  ;;  %vm3184_vm5 = vcmp.lt.s32.totalorder %v3183_v54, 0  ;;  %v1814_v19 = vsel %vm1806_vm2, %v1797_v6, %v1813_v3  ;;  %v1818_v47 = vsel %vm1806_vm2, %v1800_v43, %v1817_v9 }
 0x24b   :  { %v1557_v52 = vxor.u32 2147483648, %v3411_v12  ;;  %v1739_v39 = vsel %vm3184_vm5, 0, %v3183_v54  ;;  %v1819_v5 = vsel %vm1805_vm1, %v1816_v16, %v1818_v47  ;;  %v1886_v35 = vadd.s32 1, %v3189_v51 }
 0x24c   :  { %v1561_v44 = vsel %vm1559_vm12, %v1560_v11, %v3411_v12  ;;  %v2595_v41 = vsel %vm2593_vm7, %v1560_v11, %v3411_v12  ;;  %v1740_v22 = vsub.s32 32, %v1739_v39  ;;  %v1741_v30 = vshll.u32 %v4663_v25, %v1739_v39 }
 0x24d   :  { %v1558_v42 = vsel %vm1556_vm9, %v3409_v46, %v1557_v52  ;;  %v2592_v63 = vsel %vm2590_vm10, %v3409_v46, %v1557_v52  ;;  %v1744_v7 = vsub.s32 4294967266, %v1739_v39  ;;  %v1815_v25 = vsel %vm1805_vm1, %v1812_v17, %v1814_v19 }
 0x24e   :  { %v1562_v29 = vsel %vm1555_vm11, %v1558_v42, %v1561_v44  ;;  %v2596_v57 = vsel %vm2589_vm13, %v2592_v63, %v2595_v41  ;;  %v1742_v31 = vshrl.u32 %v1724_v59, %v1740_v22  ;;  %v1754_v6 = vsub.s32 4, %v4650_v49 }
 0x24f   :  { %v1563_v4 = vsel %vm1552_vm15, nan, %v1562_v29  ;;  %v2597_v23 = vsel %vm1552_vm15, nan, %v2596_v57  ;;  %v1745_v14 = vadd.s32 127, %v1744_v7  ;;  %v1811_v54 = vsel %vm1805_vm1, %v1808_v56, %v1810_v33 }
 0x250   :  { %v3067_v45 = vsel %vm3057_vm14, %v1563_v4, %v2597_v23  ;;  %v1743_v10 = vor.u32 %v1742_v31, %v1741_v30  ;;  %v4733_v37 = vmul.u32.u64.low %v4684_v28, %v1815_v25  ;;  %v4734_v24 = vmul.u32.u64.high %v4684_v28, %v1815_v25, %v4733_v37 }
 0x251   :  { %3077 = vst [vmem:[#allocation8 + $0x28] sm:$0xff] %v3067_v45  ;;  %v1746_v59 = vshll.u32 %v1745_v14, 23  ;;  %v4742_v1 = vmul.u32.u64.low %v4684_v28, %v1819_v5  ;;  %v4743_v48 = vmul.u32.u64.high %v4684_v28, %v1819_v5, %v4742_v1  ;;  %vm1887_vm4 = vcmp.gt.s32.totalorder %v1886_v35, 0 }
 0x252   :  { %v1750_v46 = vcvt.s32.f32 %v1743_v10  ;;  %v1830_v43 = vadd.s32 1, %v4734_v24  ;;  %v1888_v26 = vsel %vm1887_vm4, %v1886_v35, 0  ;;  %vm4750_vm6 = vcmp.le.f32.partialorder %v1668_v20, 0.7853982 }
 0x253   :  { %v1747_v60 = vor.u32 4788187, %v1746_v59  ;;  %vm1670_vm8 = vcmp.lt.s32.totalorder %v3882_v61, 0  ;;  %v1883_v12 = vand.u32 8388607, %v1876_v36  ;;  %v1890_v11 = vand.u32 31, %v1888_v26 }
 0x254   :  { %v1755_v56 = vsel %vm1670_vm8, %v1754_v6, %v4650_v49  ;;  %v1827_v2 = vmul.u32 %v4684_v28, %v1811_v54  ;;  %vm1829_vm7 = vc.u32 %v4743_v48, %v4733_v37  ;;  %v4764_v52 = vshrl.u32 %v1888_v26, 5 }
 0x255   :  { %v1748_v53 = vand.u32 2147483647, %v1747_v60  ;;  %v1831_v20 = vsel %vm1829_vm7, %v1830_v43, %v4734_v24  ;;  %v1891_v39 = vsub.s32 32, %v1890_v11  ;;  %v1893_v17 = vshll.u32 %v3524_v27, %v1890_v11 }
 0x256   :  { %v1832_v44 = vadd.s32 %v1831_v20, %v1827_v2  ;;  %v1896_v41 = vshll.u32 %v3525_v32, %v1890_v11  ;;  %v1899_v22 = vshll.u32 %v3526_v34, %v1890_v11  ;;  %v1902_v42 = vshll.u32 %v3527_v38, %v1890_v11 }
 0x257   :  { %v1751_v62 = vmul.f32 %v1750_v46, %v1748_v53  ;;  %v1894_v49 = vshrl.u32 %v3525_v32, %v1891_v39  ;;  %v1897_v28 = vshrl.u32 %v3526_v34, %v1891_v39  ;;  %v1900_v33 = vshrl.u32 %v3527_v38, %v1891_v39 }
 0x258   :  { %v1833_v30 = vadd.s32 536870912, %v1832_v44  ;;  %v1903_v7 = vshrl.u32 %v3528_v40, %v1891_v39  ;;  %v1905_v29 = vshll.u32 %v3528_v40, %v1890_v11  ;;  %v1906_v38 = vshrl.u32 %v3529_v50, %v1891_v39 }
 0x259   :  { %v1752_v3 = vxor.u32 2147483648, %v1751_v62  ;;  %v1895_v31 = vor.u32 %v1894_v49, %v1893_v17  ;;  %v1898_v32 = vor.u32 %v1897_v28, %v1896_v41  ;;  %v1901_v19 = vor.u32 %v1900_v33, %v1899_v22 }
 0x25a   :  { %v4780_v34 = vshrl.u32 %v1833_v30, 30  ;;  %v1904_v4 = vor.u32 %v1903_v7, %v1902_v42  ;;  %v1757_v23 = vsel %vm4750_vm6, 0, %v1755_v56  ;;  %v3042_v14 = vsub.s32 7, %v3952_v13 }
 0x25b   :  { %v1753_v63 = vsel %vm1670_vm8, %v1752_v3, %v1751_v62  ;;  %v1884_v40 = vor.u32 8388608, %v1883_v12  ;;  %v1907_v45 = vor.u32 %v1906_v38, %v1905_v29  ;;  %vm1908_vm9 = vcmp.lt.s32.totalorder %v4764_v52, 1 }
 0x25c   :  { %v1756_v57 = vsel %vm4750_vm6, %v3882_v61, %v1753_v63  ;;  %v1835_v25 = vshll.u32 %v4780_v34, 30  ;;  %vm1911_vm10 = vcmp.lt.s32.totalorder %v4764_v52, 4  ;;  %vm1910_vm11 = vcmp.lt.s32.totalorder %v4764_v52, 3 }
 0x25d   :  { %3412 = vcosq.f32 %v1756_v57  ;;  %v1916_v10 = vsel %vm1908_vm9, %v1895_v31, %v1898_v32  ;;  %v1917_v50 = vsel %vm1911_vm10, %v1904_v4, 920167782  ;;  %v1761_v16 = vadd.s32 3, %v1757_v23 }
 0x25e   :  { %3414 = vsinq.f32 %v1756_v57  ;;  %v1836_v9 = vsub.s32 %v1832_v44, %v1835_v25  ;;  %vm1909_vm12 = vcmp.lt.s32.totalorder %v4764_v52, 2  ;;  %v1918_v59 = vsel %vm1910_vm11, %v1901_v19, %v1917_v50 }
 0x25f   :  { %v2794_v47 = vand.u32 3, %v1757_v23  ;;  %v3043_v24 = vrot.slane %v3971_v21, %v3042_v14  ;;  %v1919_v5 = vsel %vm1909_vm12, %v1916_v10, %v1918_v59  ;;  %v1924_v35 = vshll.u32 %v1884_v40, 8 }
 0x260   :  { %v1838_v60 = vsub.s32 0, %v1836_v9  ;;  %v1920_v6 = vsel %vm1908_vm9, %v1898_v32, %v1901_v19  ;;  %v1921_v1 = vsel %vm1911_vm10, %v1907_v45, 1326507024  ;;  %v1913_v54 = vsel %vm1911_vm10, %v1901_v19, 2102212464 }
 0x261   :  { %v1922_v53 = vsel %vm1910_vm11, %v1904_v4, %v1921_v1  ;;  %v4802_v46 = vmul.u32.u64.low %v1924_v35, %v1919_v5  ;;  %v4803_v43 = vmul.u32.u64.high %v1924_v35, %v1919_v5, %v4802_v46  ;;  %v1762_v26 = vand.u32 3, %v1761_v16 }
 0x262   :  { %v3186_v51 = vmin.u32 %v1838_v60, %v1836_v9  ;;  %v1892_v21 = vshrl.u32 %v3524_v27, %v1891_v39  ;;  %vm2795_vm13 = vcmp.lt.s32.totalorder %v2794_v47, 2  ;;  %vm3059_vm14 = vcmp.eq.s32.totalorder %v3043_v24, 1 }
 0x263   :  { %v1923_v12 = vsel %vm1909_vm12, %v1920_v6, %v1922_v53  ;;  %vm2796_vm15 = vcmp.eq.s32.totalorder %v2794_v47, 0  ;;  %v1914_v2 = vsel %vm1910_vm11, %v1898_v32, %v1913_v54  ;;  %vm2799_vm0 = vcmp.eq.s32.totalorder %v2794_v47, 2 }
 0x264   :  { %v1840_v62 = vclz %v3186_v51  ;;  %v1912_v56 = vsel %vm1908_vm9, %v1892_v21, %v1895_v31  ;;  %v4813_v3 = vmul.u32.u64.low %v1924_v35, %v1923_v12  ;;  %v4814_v44 = vmul.u32.u64.high %v1924_v35, %v1923_v12, %v4813_v3 }
 0x265   :  { %vm1763_vm1 = vcmp.lt.s32.totalorder %v1762_v26, 2  ;;  %vm1767_vm2 = vcmp.eq.s32.totalorder %v1762_v26, 2  ;;  %vm1764_vm3 = vcmp.eq.s32.totalorder %v1762_v26, 0  ;;  %v1915_v49 = vsel %vm1909_vm12, %v1912_v56, %v1914_v2 }
 0x266   :  { %v3187_v39 = vadd.s32 4294967294, %v1840_v62  ;;  %v1934_v42 = vadd.s32 1, %v4803_v43  ;;  %vm1760_vm4 = vweird.f32 %v3882_v61  ;;  %v1828_v31 = vadd.s32 %v4733_v37, %v4743_v48 }
 0x267   :  { %v3413_v11 = vpop.eup %3412  ;;  %v1931_v4 = vmul.u32 %v1924_v35, %v1915_v49  ;;  %vm1933_vm6 = vc.u32 %v4814_v44, %v4802_v46  ;;  %v1858_v24 = vsub.s32 4, %v4780_v34  ;;  %vm1774_vm8 = vcmp.lt.s32.totalorder %v4056_v8, 0 }
 0x268   :  { %v3415_v20 = vpop.eup %3414  ;;  %v1768_v17 = vxor.u32 2147483648, %v3413_v11  ;;  %vm3188_vm5 = vcmp.lt.s32.totalorder %v3187_v39, 0  ;;  %v1935_v61 = vsel %vm1933_vm6, %v1934_v42, %v4803_v43  ;;  %vm1773_vm7 = vcmp.le.f32.partialorder %v1772_v15, 0.7853982 }
 0x269   :  { %v1765_v27 = vxor.u32 2147483648, %v3415_v20  ;;  %v1843_v7 = vsel %vm3188_vm5, 0, %v3187_v39  ;;  %v1936_v40 = vadd.s32 %v1935_v61, %v1931_v4  ;;  %v1859_v1 = vsel %vm1774_vm8, %v1858_v24, %v4780_v34 }
 0x26a   :  { %v1769_v41 = vsel %vm1767_vm2, %v1768_v17, %v3415_v20  ;;  %v2801_v22 = vsel %vm2799_vm0, %v1768_v17, %v3415_v20  ;;  %v1844_v32 = vsub.s32 32, %v1843_v7  ;;  %v1848_v19 = vsub.s32 4294967266, %v1843_v7 }
 0x26b   :  { %v1766_v28 = vsel %vm1764_vm3, %v3413_v11, %v1765_v27  ;;  %v2798_v33 = vsel %vm2796_vm15, %v3413_v11, %v1765_v27  ;;  %v1845_v23 = vshll.u32 %v1836_v9, %v1843_v7  ;;  %v1937_v10 = vadd.s32 536870912, %v1936_v40  ;;  %v937_v9 = vld [vmem:[#allocation7 + $0x8] sm:$0x3] }
 0x26c   :  { %v1770_v63 = vsel %vm1763_vm1, %v1766_v28, %v1769_v41  ;;  %v2802_v30 = vsel %vm2795_vm13, %v2798_v33, %v2801_v22  ;;  %v1846_v38 = vshrl.u32 %v1828_v31, %v1844_v32  ;;  %v1849_v14 = vadd.s32 127, %v1848_v19 }
 0x26d   :  { %v1771_v29 = vsel %vm1760_vm4, nan, %v1770_v63  ;;  %v2803_v57 = vsel %vm1760_vm4, nan, %v2802_v30  ;;  %v4828_v37 = vshrl.u32 %v1937_v10, 30  ;;  %vm939_vm9 = vcmp.ne.s32.totalorder %v937_v9, 0 }
 0x26e   :  { %v3069_v52 = vsel %vm3059_vm14, %v1771_v29, %v2803_v57  ;;  %v1847_v25 = vor.u32 %v1846_v38, %v1845_v23  ;;  %v1850_v45 = vshll.u32 %v1849_v14, 23  ;;  %v1861_v26 = vsel %vm1773_vm7, 0, %v1859_v1 }
 0x26f   :  { %3079 = vst [vmem:[#allocation8 + $0x38] sm:$0xff] %v3069_v52  ;;  %v1939_v59 = vshll.u32 %v4828_v37, 30  ;;  %v1865_v21 = vadd.s32 3, %v1861_v26  ;;  %v3011_v12 = vsel %vm939_vm9, 1, %v3523_v0  ;;  %v1932_v15 = vadd.s32 %v4802_v46, %v4814_v44 }
 0x270   :  { %v1851_v50 = vor.u32 4788187, %v1850_v45  ;;  %v1854_v16 = vcvt.s32.f32 %v1847_v25  ;;  %v2897_v34 = vand.u32 3, %v1861_v26  ;;  %v3047_v2 = vrot.slane %v3011_v12, %v3014_v18 }
 0x271   :  { %v1940_v5 = vsub.s32 %v1936_v40, %v1939_v59  ;;  %v1866_v20 = vand.u32 3, %v1865_v21  ;;  %vm1864_vm2 = vweird.f32 %v4056_v8  ;;  %v1962_v52 = vsub.s32 4, %v4828_v37 }
 0x272   :  { %v1852_v48 = vand.u32 2147483647, %v1851_v50  ;;  %vm2898_vm11 = vcmp.lt.s32.totalorder %v2897_v34, 2  ;;  %vm2899_vm12 = vcmp.eq.s32.totalorder %v2897_v34, 0  ;;  %vm3060_vm13 = vcmp.eq.s32.totalorder %v3047_v2, 1 }
 0x273   :  { %v1942_v60 = vsub.s32 0, %v1940_v5  ;;  %vm1871_vm14 = vcmp.eq.s32.totalorder %v1866_v20, 2  ;;  %vm2902_vm15 = vcmp.eq.s32.totalorder %v2897_v34, 2  ;;  %vm1867_vm0 = vcmp.lt.s32.totalorder %v1866_v20, 2 }
 0x274   :  { %v1855_v47 = vmul.f32 %v1854_v16, %v1852_v48  ;;  %vm1868_vm1 = vcmp.eq.s32.totalorder %v1866_v20, 0  ;;  %vm1878_vm3 = vcmp.lt.s32.totalorder %v4157_v58, 0  ;;  %vm1877_vm5 = vcmp.le.f32.partialorder %v1876_v36, 0.7853982 }
 0x275   :  { %v3190_v54 = vmin.u32 %v1942_v60, %v1940_v5  ;;  %v3051_v45 = vrot.slane %v3011_v12, %v3018_v55 }
 0x276   :  { %v1856_v35 = vxor.u32 2147483648, %v1855_v47 }
 0x277   :  { %v1944_v43 = vclz %v3190_v54 }
 0x278   :  { %v1857_v6 = vsel %vm1774_vm8, %v1856_v35, %v1855_v47  ;;  %vm3061_vm8 = vcmp.eq.s32.totalorder %v3051_v45, 1 }
 0x279   :  { %v1860_v53 = vsel %vm1773_vm7, %v4056_v8, %v1857_v6  ;;  %v3191_v51 = vadd.s32 4294967294, %v1944_v43  ;;  %v1963_v8 = vsel %vm1878_vm3, %v1962_v52, %v4828_v37 }
 0x27a   :  { %3416 = vcosq.f32 %v1860_v53  ;;  %v1965_v23 = vsel %vm1877_vm5, 0, %v1963_v8 }
 0x27b   :  { %3418 = vsinq.f32 %v1860_v53  ;;  %vm3192_vm10 = vcmp.lt.s32.totalorder %v3191_v51, 0  ;;  %v1969_v14 = vadd.s32 3, %v1965_v23  ;;  %v3000_v25 = vand.u32 3, %v1965_v23 }
 0x27c   :  { %v1947_v11 = vsel %vm3192_vm10, 0, %v3191_v51 }
 0x27d   :  { %v1948_v62 = vsub.s32 32, %v1947_v11  ;;  %v1952_v56 = vsub.s32 4294967266, %v1947_v11  ;;  %v1949_v17 = vshll.u32 %v1940_v5, %v1947_v11  ;;  %v1970_v40 = vand.u32 3, %v1969_v14 }
 0x27e   :  { %vm3005_vm6 = vcmp.eq.s32.totalorder %v3000_v25, 2  ;;  %vm3002_vm9 = vcmp.eq.s32.totalorder %v3000_v25, 0 }
 0x27f   :  { %v1950_v3 = vshrl.u32 %v1932_v15, %v1948_v62  ;;  %v1953_v27 = vadd.s32 127, %v1952_v56  ;;  %vm1975_vm4 = vcmp.eq.s32.totalorder %v1970_v40, 2  ;;  %vm1972_vm7 = vcmp.eq.s32.totalorder %v1970_v40, 0 }
 0x280   :  { %vm1971_vm10 = vcmp.lt.s32.totalorder %v1970_v40, 2 }
 0x281   :  { %v1951_v41 = vor.u32 %v1950_v3, %v1949_v17  ;;  %v1954_v22 = vshll.u32 %v1953_v27, 23 }
 0x283   :  { %v1955_v46 = vor.u32 4788187, %v1954_v22  ;;  %v1958_v30 = vcvt.s32.f32 %v1951_v41 }
 0x284   :  { %v3417_v39 = vpop.eup %3416 }
 0x285   :  { %v3419_v49 = vpop.eup %3418  ;;  %v1872_v0 = vxor.u32 2147483648, %v3417_v39  ;;  %v1956_v63 = vand.u32 2147483647, %v1955_v46 }
 0x286   :  { %v1869_v28 = vxor.u32 2147483648, %v3419_v49 }
 0x287   :  { %v1873_v44 = vsel %vm1871_vm14, %v1872_v0, %v3419_v49  ;;  %v2904_v18 = vsel %vm2902_vm15, %v1872_v0, %v3419_v49  ;;  %v1959_v32 = vmul.f32 %v1958_v30, %v1956_v63 }
 0x288   :  { %v1870_v33 = vsel %vm1868_vm1, %v3417_v39, %v1869_v28  ;;  %v2901_v42 = vsel %vm2899_vm12, %v3417_v39, %v1869_v28  ;;  %vm1968_vm12 = vweird.f32 %v4157_v58 }
 0x289   :  { %v1874_v7 = vsel %vm1867_vm0, %v1870_v33, %v1873_v44  ;;  %v2905_v29 = vsel %vm2898_vm11, %v2901_v42, %v2904_v18  ;;  %v1960_v4 = vxor.u32 2147483648, %v1959_v32  ;;  %vm3001_vm11 = vcmp.lt.s32.totalorder %v3000_v25, 2 }
 0x28a   :  { %v1875_v57 = vsel %vm1864_vm2, nan, %v1874_v7  ;;  %v2906_v31 = vsel %vm1864_vm2, nan, %v2905_v29 }
 0x28b   :  { %v3070_v19 = vsel %vm3060_vm13, %v1875_v57, %v2906_v31  ;;  %v1961_v38 = vsel %vm1878_vm3, %v1960_v4, %v1959_v32 }
 0x28c   :  { %3080 = vst [vmem:[#allocation8 + $0x40] sm:$0xff] %v3070_v19  ;;  %v1964_v61 = vsel %vm1877_vm5, %v4157_v58, %v1961_v38 }
 0x28d   :  { %3420 = vcosq.f32 %v1964_v61 }
 0x28e   :  { %3422 = vsinq.f32 %v1964_v61 }
 0x297   :  { %v3421_v10 = vpop.eup %3420 }
 0x298   :  { %v3423_v50 = vpop.eup %3422  ;;  %v1976_v48 = vxor.u32 2147483648, %v3421_v10 }
 0x299   :  { %v1973_v16 = vxor.u32 2147483648, %v3423_v50 }
 0x29a   :  { %v1977_v36 = vsel %vm1975_vm4, %v1976_v48, %v3423_v50  ;;  %v3007_v37 = vsel %vm3005_vm6, %v1976_v48, %v3423_v50 }
 0x29b   :  { %v1974_v59 = vsel %vm1972_vm7, %v3421_v10, %v1973_v16  ;;  %v3004_v47 = vsel %vm3002_vm9, %v3421_v10, %v1973_v16 }
 0x29c   :  { %v1978_v13 = vsel %vm1971_vm10, %v1974_v59, %v1977_v36  ;;  %v3008_v55 = vsel %vm3001_vm11, %v3004_v47, %v3007_v37 }
 0x29d   :  { %v1979_v24 = vsel %vm1968_vm12, nan, %v1978_v13  ;;  %v3009_v5 = vsel %vm1968_vm12, nan, %v3008_v55 }
 0x29e   :  { %v3071_v35 = vsel %vm3061_vm8, %v1979_v24, %v3009_v5 }
 0x29f   :  { %3081 = vst [vmem:[#allocation8 + $0x48] sm:$0xff] %v3071_v35 }
 0x2a0   :  { %3501 = shalt.err (!%p3498_p0)
}
 0x2a1   :  { %s3502_s25 = scalar_lea.hbm %s4870_s3, 1280 }
 0x2a2   :  { %p3503_p1 = scmp.ne.s32.totalorder %s4870_s3, %s3502_s25  ;;  %p3506_p2 = scmp.lt.u32.totalorder %s3502_s25, %s4870_s3 }
 0x2a4   :  { %p3508_p3 = pnand %p3506_p2, %p3503_p1 }
 0x2a6   :  { %3511 = shalt.err (!%p3508_p3)
}
 0x2a7   :  { %3091 = dma.vmem_to_hbm [thread:$0]  %s3089_s21, 1280, %s4870_s3, [#allocation4]  }
 0x2a8   :  { %3516 = dma.done.wait [#allocation4], 1280  }
 0x2a9   :  { %3517 = vsyncadd [#allocation4], 4294966016 }
 0x2aa   :  { %3095 = vsyncpa [#allocation3], 1 }
 0x2ab   :  { %3096 = vsyncpa [#allocation6], 1 }
 0x2ac   :  { %3097 = vsyncpa [#allocation4], 1 }

</bundles_post_ra>
